<compile_context>
chip_gen: v6e
topology: v6e:2x2x1
jax: 0.10.0
libtpu: 0.0.40
codegen_flags: <defaults>
</compile_context>

<pallas_src>
import functools

import jax
import jax.numpy as jnp
from jax.experimental import pallas as pl
from jax.experimental.pallas import tpu as pltpu


# Packed per-layer vector rows (all lane-padded to maxw):
#   0: ln1_gamma  1: ln1_beta  2: b_out  3: ln2_gamma  4: ln2_beta
#   5: b_ff1      6: b_ff2     7: (unused padding row)
_N_VEC_ROWS = 8


# ----------------------------------------------------------------------------
# small math helpers
# ----------------------------------------------------------------------------

def _gelu_tanh(x):
    c = 0.7978845608028654  # sqrt(2/pi)
    return 0.5 * x * (1.0 + jnp.tanh(c * (x + 0.044715 * x * x * x)))


def _layer_norm_1pass(x, gamma, beta, eps=1e-5):
    # Single-pass LayerNorm: reduce sum(x) and sum(x*x) independently (no
    # sequential dependency between the two XLU reductions).  Accumulation is
    # f32, so E[x^2] - mu^2 cancellation is not a concern at these magnitudes.
    m1 = jnp.mean(x, axis=-1, keepdims=True)
    m2 = jnp.mean(x * x, axis=-1, keepdims=True)
    return (x - m1) * jax.lax.rsqrt(m2 - m1 * m1 + eps) * gamma + beta


# ----------------------------------------------------------------------------
# fused Pallas kernel: grid=(depth,), activation carried in the resident o_ref
# ----------------------------------------------------------------------------

def _transformer_kernel(x_ref, vec_ref, wqkv_ref, wo_ref, wf1_ref, wf2_ref,
                        o_ref, *, batch, seq, heads, dim_head, dim, mlp_dim):
    layer = pl.program_id(0)

    @pl.when(layer == 0)
    def _():
        o_ref[...] = x_ref[...]            # seed the carried activation slab

    inner = heads * dim_head

    vecs = vec_ref[0]                      # (8, maxw) f32, packed per-layer vecs
    g1, b1 = vecs[0:1, :dim], vecs[1:2, :dim]
    b_out = vecs[2:3, :dim]
    g2, b2 = vecs[3:4, :dim], vecs[4:5, :dim]
    b_ff1 = vecs[5:6, :mlp_dim]
    b_ff2 = vecs[6:7, :dim]

    wqkv = wqkv_ref[0]                     # (D, 3*inner) bf16, Q cols pre-scaled
    wo = wo_ref[0]                         # (inner, D)   bf16
    wf1 = wf1_ref[0]                       # (D, mlp_dim) bf16
    wf2 = wf2_ref[0]                       # (mlp_dim, D) bf16

    # ------------------ PreNorm attention + residual ------------------
    x = o_ref[...]                                                   # (B*N, D) f32
    xn = _layer_norm_1pass(x, g1, b1).astype(jnp.bfloat16)
    qkv = jnp.dot(xn, wqkv, preferred_element_type=jnp.float32)      # (B*N, 3I)
    qkv = qkv.astype(jnp.bfloat16)

    for b in range(batch):                                           # static unroll
        r0 = b * seq
        acc = None
        for h in range(heads):                                       # static unroll
            c0 = h * dim_head
            qh = qkv[r0:r0 + seq, c0:c0 + dim_head]                              # (N, dh)
            kh = qkv[r0:r0 + seq, inner + c0:inner + c0 + dim_head]              # (N, dh)
            vh = qkv[r0:r0 + seq, 2 * inner + c0:2 * inner + c0 + dim_head]      # (N, dh)
            # q @ k^T (scale already folded into the Q weights)
            dots = jax.lax.dot_general(qh, kh, (((1,), (1,)), ((), ())),
                                       preferred_element_type=jnp.float32)       # (N, N)
            p = jnp.exp(dots - jnp.max(dots, axis=-1, keepdims=True))            # unnormalized
            pv = jnp.dot(p.astype(jnp.bfloat16), vh,
                         preferred_element_type=jnp.float32)                     # (N, dh)
            inv = pl.reciprocal(jnp.sum(p, axis=-1, keepdims=True), approx=True)
            head_out = (pv * inv).astype(jnp.bfloat16)
            # accumulate the output projection head-by-head -> no concat/reshape
            contrib = jnp.dot(head_out, wo[c0:c0 + dim_head, :],
                              preferred_element_type=jnp.float32)                # (N, D)
            acc = contrib if acc is None else acc + contrib
        # residual add, written directly into the carried activation rows
        o_ref[r0:r0 + seq, :] = x[r0:r0 + seq, :] + acc + b_out

    # ------------------ PreNorm feed-forward + residual ------------------
    x = o_ref[...]
    xn2 = _layer_norm_1pass(x, g2, b2).astype(jnp.bfloat16)
    h1 = jnp.dot(xn2, wf1, preferred_element_type=jnp.float32) + b_ff1
    h1 = _gelu_tanh(h1).astype(jnp.bfloat16)
    h2 = jnp.dot(h1, wf2, preferred_element_type=jnp.float32) + b_ff2
    o_ref[...] = x + h2


# ----------------------------------------------------------------------------
# wrapper: packing, scale folding, BlockSpecs, VMEM budget
# ----------------------------------------------------------------------------

def _pack_vectors(params, dim, mlp_dim):
    depth = params['w_qkv'].shape[0]
    maxw = ((max(dim, mlp_dim) + 127) // 128) * 128

    def row(v, w):
        return jnp.pad(v.astype(jnp.float32), ((0, 0), (0, 0), (0, maxw - w)))

    rows = [row(params['ln1_g'], dim), row(params['ln1_b'], dim),
            row(params['b_out'], dim), row(params['ln2_g'], dim),
            row(params['ln2_b'], dim), row(params['b_ff1'], mlp_dim),
            row(params['b_ff2'], dim),
            jnp.zeros((depth, 1, maxw), jnp.float32)]
    return jnp.concatenate(rows, axis=1)           # (depth, 8, maxw)


def _vmem_limit_bytes(bn, dim, inner, mlp_dim, maxw):
    acts = bn * dim * 4 * 2                                        # x in + carried out
    vecs = _N_VEC_ROWS * maxw * 4
    wts = (dim * 3 * inner + inner * dim + dim * mlp_dim + mlp_dim * dim) * 2
    inter = bn * 3 * inner * 6 + bn * mlp_dim * 6 + 6 * bn * dim * 4
    need = 2 * (acts + vecs + wts) + inter                         # double-buffered + temps
    need = int(need * 2) + (4 << 20)                               # generous headroom
    return max(32 << 20, min(need, 96 << 20))                      # never below default


def transformer_forward(x, params, *, heads, dim_head):
    B, N, D = x.shape
    depth = params['w_qkv'].shape[0]
    inner = heads * dim_head
    mlp_dim = params['w_ff1'].shape[-1]
    maxw = ((max(D, mlp_dim) + 127) // 128) * 128
    bn = B * N

    # Fold the attention scale into the Q columns of w_qkv (free, one-time).
    scale = float(dim_head) ** -0.5
    wqkv = params['w_qkv']
    wqkv = jnp.concatenate(
        [(wqkv[:, :, :inner].astype(jnp.float32) * scale).astype(wqkv.dtype),
         wqkv[:, :, inner:]], axis=-1)

    vecs = _pack_vectors(params, D, mlp_dim)
    x2 = x.reshape(bn, D).astype(jnp.float32)        # lane-dense activation slab

    kernel = functools.partial(_transformer_kernel, batch=B, seq=N, heads=heads,
                               dim_head=dim_head, dim=D, mlp_dim=mlp_dim)

    def per_layer(rows, cols):                       # streamed per-layer block
        return pl.BlockSpec((1, rows, cols), lambda l: (l, 0, 0))

    out = pl.pallas_call(
        kernel,
        out_shape=jax.ShapeDtypeStruct((bn, D), jnp.float32),
        grid_spec=pltpu.PrefetchScalarGridSpec(
            num_scalar_prefetch=0,
            grid=(depth,),
            in_specs=[
                pl.BlockSpec((bn, D), lambda l: (0, 0)),   # x (read at layer 0 only)
                per_layer(_N_VEC_ROWS, maxw),              # packed LN/bias vectors
                per_layer(D, 3 * inner),                   # w_qkv (Q pre-scaled)
                per_layer(inner, D),                       # w_out
                per_layer(D, mlp_dim),                     # w_ff1
                per_layer(mlp_dim, D),                     # w_ff2
            ],
            out_specs=pl.BlockSpec((bn, D), lambda l: (0, 0)),  # resident carry
        ),
        compiler_params=pltpu.CompilerParams(
            dimension_semantics=("arbitrary",),             # layers carry state serially
            vmem_limit_bytes=_vmem_limit_bytes(bn, D, inner, mlp_dim, maxw)),
    )(x2, vecs, wqkv, params['w_out'], params['w_ff1'], params['w_ff2'])
    return out.reshape(B, N, D)


# ----------------------------------------------------------------------------
# pure-JAX reference (standard formulation; XLA matmuls, bf16 operands)
# ----------------------------------------------------------------------------

def _layer_norm_ref(x, gamma, beta, eps=1e-5):
    mu = jnp.mean(x, axis=-1, keepdims=True)
    var = jnp.mean((x - mu) ** 2, axis=-1, keepdims=True)
    return (x - mu) / jnp.sqrt(var + eps) * gamma + beta


def transformer_reference(x, params, *, heads, dim_head):
    B, N, D = x.shape
    depth = params['w_qkv'].shape[0]
    inner = heads * dim_head
    scale = float(dim_head) ** -0.5
    h = x.astype(jnp.float32)
    for l in range(depth):
        xn = _layer_norm_ref(h, params['ln1_g'][l], params['ln1_b'][l])
        qkv = jnp.dot(xn.astype(jnp.bfloat16), params['w_qkv'][l],
                      preferred_element_type=jnp.float32)            # (B, N, 3I)
        q, k, v = jnp.split(qkv, 3, axis=-1)

        def split_heads(t):
            return t.reshape(B, N, heads, dim_head).transpose(0, 2, 1, 3)

        q, k, v = map(split_heads, (q, k, v))
        dots = jnp.einsum('bhnd,bhmd->bhnm', q.astype(jnp.bfloat16),
                          k.astype(jnp.bfloat16),
                          preferred_element_type=jnp.float32) * scale
        attn = jax.nn.softmax(dots, axis=-1)
        out = jnp.einsum('bhnm,bhmd->bhnd', attn.astype(jnp.bfloat16),
                         v.astype(jnp.bfloat16),
                         preferred_element_type=jnp.float32)
        out = out.transpose(0, 2, 1, 3).reshape(B, N, inner)
        proj = jnp.dot(out.astype(jnp.bfloat16), params['w_out'][l],
                       preferred_element_type=jnp.float32) + params['b_out'][l]
        h = h + proj

        xn2 = _layer_norm_ref(h, params['ln2_g'][l], params['ln2_b'][l])
        h1 = jnp.dot(xn2.astype(jnp.bfloat16), params['w_ff1'][l],
                     preferred_element_type=jnp.float32) + params['b_ff1'][l]
        h1 = _gelu_tanh(h1)
        h2 = jnp.dot(h1.astype(jnp.bfloat16), params['w_ff2'][l],
                     preferred_element_type=jnp.float32) + params['b_ff2'][l]
        h = h + h2
    return h


# ----------------------------------------------------------------------------
# deterministic parameter init (PyTorch nn.Linear-style uniform)
# ----------------------------------------------------------------------------

def _uniform(key, shape, fan_in, dtype=jnp.float32):
    bound = 1.0 / float(fan_in) ** 0.5
    return jax.random.uniform(key, shape, jnp.float32, -bound, bound).astype(dtype)


def init_params(key, *, depth, dim, heads, dim_head, mlp_dim):
    inner = heads * dim_head
    names = ('ln1_g', 'ln1_b', 'w_qkv', 'w_out', 'b_out',
             'ln2_g', 'ln2_b', 'w_ff1', 'b_ff1', 'w_ff2', 'b_ff2')
    layers = {n: [] for n in names}
    for _ in range(depth):
        key, *ks = jax.random.split(key, 12)
        layers['ln1_g'].append(1.0 + 0.02 * jax.random.normal(ks[0], (1, dim)))
        layers['ln1_b'].append(0.02 * jax.random.normal(ks[1], (1, dim)))
        layers['w_qkv'].append(_uniform(ks[2], (dim, 3 * inner), dim, jnp.bfloat16))
        layers['w_out'].append(_uniform(ks[3], (inner, dim), inner, jnp.bfloat16))
        layers['b_out'].append(_uniform(ks[4], (1, dim), inner))
        layers['ln2_g'].append(1.0 + 0.02 * jax.random.normal(ks[5], (1, dim)))
        layers['ln2_b'].append(0.02 * jax.random.normal(ks[6], (1, dim)))
        layers['w_ff1'].append(_uniform(ks[7], (dim, mlp_dim), dim, jnp.bfloat16))
        layers['b_ff1'].append(_uniform(ks[8], (1, mlp_dim), dim))
        layers['w_ff2'].append(_uniform(ks[9], (mlp_dim, dim), mlp_dim, jnp.bfloat16))
        layers['b_ff2'].append(_uniform(ks[10], (1, dim), mlp_dim))
    return {n: jnp.stack(v) for n, v in layers.items()}


# ----------------------------------------------------------------------------
if __name__ == "__main__":
    key = jax.random.PRNGKey(0)

    # small, lane-aligned shapes consistent with the module
    B, N = 2, 16                  # batch, sequence length
    DIM = 128                     # model dim (maps to the 128-lane axis)
    DEPTH = 2
    HEADS, DIM_HEAD = 2, 128      # inner_dim = 256; project_out = True
    MLP_DIM = 256

    kx, kp = jax.random.split(key)
    x = jax.random.normal(kx, (B, N, DIM), jnp.float32)
    params = init_params(kp, depth=DEPTH, dim=DIM, heads=HEADS,
                         dim_head=DIM_HEAD, mlp_dim=MLP_DIM)

    out = jax.block_until_ready(
        transformer_forward(x, params, heads=HEADS, dim_head=DIM_HEAD))
    assert out.shape == (B, N, DIM), out.shape

    ref = jax.block_until_ready(
        transformer_reference(x, params, heads=HEADS, dim_head=DIM_HEAD))
    max_err = float(jnp.max(jnp.abs(out - ref)))
    assert jnp.allclose(out, ref, rtol=2e-2, atol=2e-2), max_err

    print("KERNEL_OK")
</pallas_src>

<mosaic_0001>
module attributes {stable_mosaic.version = 11 : i64} {
  func.func @_transformer_kernel(%arg0: i32, %arg1: memref<32x128xf32, #tpu.memory_space<vmem>>, %arg2: memref<1x8x256xf32, #tpu.memory_space<vmem>>, %arg3: memref<1x128x768xbf16, #tpu.memory_space<vmem>>, %arg4: memref<1x256x128xbf16, #tpu.memory_space<vmem>>, %arg5: memref<1x128x256xbf16, #tpu.memory_space<vmem>>, %arg6: memref<1x256x128xbf16, #tpu.memory_space<vmem>>, %arg7: memref<32x128xf32, #tpu.memory_space<vmem>>) attributes {dimension_semantics = [#tpu.dimension_semantics<arbitrary>], iteration_bounds = array<i64: 2>, scalar_prefetch = 0 : i64, scratch_operands = 0 : i64, tpu.core_type = #tpu.core_type<tc>, window_params = [{pipeline_mode = #tpu.pipeline_mode<synchronous>, transform_indices = @transform_0, window_bounds = array<i64: 32, 128>}, {transform_indices = @transform_1, window_bounds = array<i64: 1, 8, 256>}, {transform_indices = @transform_2, window_bounds = array<i64: 1, 128, 768>}, {transform_indices = @transform_3, window_bounds = array<i64: 1, 256, 128>}, {transform_indices = @transform_4, window_bounds = array<i64: 1, 128, 256>}, {transform_indices = @transform_5, window_bounds = array<i64: 1, 256, 128>}, {pipeline_mode = #tpu.pipeline_mode<synchronous>, transform_indices = @transform_6, window_bounds = array<i64: 32, 128>}]} {
    %c0_i32 = arith.constant 0 : i32
    %0 = arith.cmpi eq, %arg0, %c0_i32 : i32
    %1 = arith.extui %0 : i1 to i32
    %c0_i32_0 = arith.constant 0 : i32
    %2 = arith.cmpi ne, %1, %c0_i32_0 : i32
    scf.if %2 {
      %c0_60 = arith.constant 0 : index
      %c0_61 = arith.constant 0 : index
      %180 = vector.load %arg1[%c0_60, %c0_61] : memref<32x128xf32, #tpu.memory_space<vmem>>, vector<32x128xf32>
      %c0_62 = arith.constant 0 : index
      %c0_63 = arith.constant 0 : index
      %181 = vector.load %arg7[%c0_62, %c0_63] : memref<32x128xf32, #tpu.memory_space<vmem>>, vector<32x128xf32>
      tpu.vector_store %arg7[%c0_62, %c0_63], %180 {strides = array<i32>} : memref<32x128xf32, #tpu.memory_space<vmem>>, vector<32x128xf32>,
    } else {
    }
    %c0 = arith.constant 0 : index
    %c0_1 = arith.constant 0 : index
    %c0_2 = arith.constant 0 : index
    %3 = vector.load %arg2[%c0, %c0_1, %c0_2] : memref<1x8x256xf32, #tpu.memory_space<vmem>>, vector<1x8x256xf32>
    %4 = vector.shape_cast %3 : vector<1x8x256xf32> to vector<8x256xf32>
    %5 = vector.extract_strided_slice %4 {offsets = [0, 0], sizes = [1, 128], strides = [1, 1]} : vector<8x256xf32> to vector<1x128xf32>
    %6 = vector.extract_strided_slice %4 {offsets = [1, 0], sizes = [1, 128], strides = [1, 1]} : vector<8x256xf32> to vector<1x128xf32>
    %7 = vector.extract_strided_slice %4 {offsets = [2, 0], sizes = [1, 128], strides = [1, 1]} : vector<8x256xf32> to vector<1x128xf32>
    %8 = vector.extract_strided_slice %4 {offsets = [3, 0], sizes = [1, 128], strides = [1, 1]} : vector<8x256xf32> to vector<1x128xf32>
    %9 = vector.extract_strided_slice %4 {offsets = [4, 0], sizes = [1, 128], strides = [1, 1]} : vector<8x256xf32> to vector<1x128xf32>
    %10 = vector.extract_strided_slice %4 {offsets = [5, 0], sizes = [1, 256], strides = [1, 1]} : vector<8x256xf32> to vector<1x256xf32>
    %11 = vector.extract_strided_slice %4 {offsets = [6, 0], sizes = [1, 128], strides = [1, 1]} : vector<8x256xf32> to vector<1x128xf32>
    %c0_3 = arith.constant 0 : index
    %c0_4 = arith.constant 0 : index
    %c0_5 = arith.constant 0 : index
    %12 = vector.load %arg3[%c0_3, %c0_4, %c0_5] : memref<1x128x768xbf16, #tpu.memory_space<vmem>>, vector<1x128x768xbf16>
    %13 = vector.shape_cast %12 : vector<1x128x768xbf16> to vector<128x768xbf16>
    %c0_6 = arith.constant 0 : index
    %c0_7 = arith.constant 0 : index
    %c0_8 = arith.constant 0 : index
    %14 = vector.load %arg4[%c0_6, %c0_7, %c0_8] : memref<1x256x128xbf16, #tpu.memory_space<vmem>>, vector<1x256x128xbf16>
    %15 = vector.shape_cast %14 : vector<1x256x128xbf16> to vector<256x128xbf16>
    %c0_9 = arith.constant 0 : index
    %c0_10 = arith.constant 0 : index
    %c0_11 = arith.constant 0 : index
    %16 = vector.load %arg5[%c0_9, %c0_10, %c0_11] : memref<1x128x256xbf16, #tpu.memory_space<vmem>>, vector<1x128x256xbf16>
    %17 = vector.shape_cast %16 : vector<1x128x256xbf16> to vector<128x256xbf16>
    %c0_12 = arith.constant 0 : index
    %c0_13 = arith.constant 0 : index
    %c0_14 = arith.constant 0 : index
    %18 = vector.load %arg6[%c0_12, %c0_13, %c0_14] : memref<1x256x128xbf16, #tpu.memory_space<vmem>>, vector<1x256x128xbf16>
    %19 = vector.shape_cast %18 : vector<1x256x128xbf16> to vector<256x128xbf16>
    %c0_15 = arith.constant 0 : index
    %c0_16 = arith.constant 0 : index
    %20 = vector.load %arg7[%c0_15, %c0_16] : memref<32x128xf32, #tpu.memory_space<vmem>>, vector<32x128xf32>
    %cst = arith.constant dense<0.000000e+00> : vector<32xf32>
    %21 = vector.multi_reduction <add>, %20, %cst [1] : vector<32x128xf32> to vector<32xf32>
    %22 = vector.shape_cast %21 : vector<32xf32> to vector<32x1xf32>
    %cst_17 = arith.constant 1.280000e+02 : f32
    %23 = vector.broadcast %cst_17 : f32 to vector<32x1xf32>
    %24 = arith.divf %22, %23 : vector<32x1xf32>
    %25 = arith.mulf %20, %20 : vector<32x128xf32>
    %cst_18 = arith.constant dense<0.000000e+00> : vector<32xf32>
    %26 = vector.multi_reduction <add>, %25, %cst_18 [1] : vector<32x128xf32> to vector<32xf32>
    %27 = vector.shape_cast %26 : vector<32xf32> to vector<32x1xf32>
    %cst_19 = arith.constant 1.280000e+02 : f32
    %28 = vector.broadcast %cst_19 : f32 to vector<32x1xf32>
    %29 = arith.divf %27, %28 : vector<32x1xf32>
    %30 = vector.broadcast %24 : vector<32x1xf32> to vector<32x128xf32>
    %31 = arith.subf %20, %30 : vector<32x128xf32>
    %32 = arith.mulf %24, %24 : vector<32x1xf32>
    %33 = arith.subf %29, %32 : vector<32x1xf32>
    %cst_20 = arith.constant 9.99999974E-6 : f32
    %34 = vector.broadcast %cst_20 : f32 to vector<32x1xf32>
    %35 = arith.addf %33, %34 : vector<32x1xf32>
    %36 = math.rsqrt %35 : vector<32x1xf32>
    %37 = vector.broadcast %36 : vector<32x1xf32> to vector<32x128xf32>
    %38 = arith.mulf %31, %37 : vector<32x128xf32>
    %39 = vector.broadcast %5 : vector<1x128xf32> to vector<32x128xf32>
    %40 = arith.mulf %38, %39 : vector<32x128xf32>
    %41 = vector.broadcast %6 : vector<1x128xf32> to vector<32x128xf32>
    %42 = arith.addf %40, %41 : vector<32x128xf32>
    %43 = arith.truncf %42 : vector<32x128xf32> to vector<32x128xbf16>
    %cst_21 = arith.constant dense<0.000000e+00> : vector<32x768xf32>
    %44 = tpu.matmul %43, %13, %cst_21 {dimension_numbers = #tpu.dot_dimension_numbers<[1], [0], [0], [1], [0, 0, 1, 1], [], []>} : vector<32x128xbf16>, vector<128x768xbf16>, vector<32x768xf32> -> vector<32x768xf32>
    %45 = arith.truncf %44 : vector<32x768xf32> to vector<32x768xbf16>
    %46 = vector.extract_strided_slice %45 {offsets = [0, 0], sizes = [16, 128], strides = [1, 1]} : vector<32x768xbf16> to vector<16x128xbf16>
    %47 = vector.extract_strided_slice %45 {offsets = [0, 256], sizes = [16, 128], strides = [1, 1]} : vector<32x768xbf16> to vector<16x128xbf16>
    %48 = vector.extract_strided_slice %45 {offsets = [0, 512], sizes = [16, 128], strides = [1, 1]} : vector<32x768xbf16> to vector<16x128xbf16>
    %cst_22 = arith.constant dense<0.000000e+00> : vector<16x16xf32>
    %49 = tpu.matmul %46, %47, %cst_22 {dimension_numbers = #tpu.dot_dimension_numbers<[1], [1], [0], [0], [0, 0, 1, 0], [], []>} : vector<16x128xbf16>, vector<16x128xbf16>, vector<16x16xf32> -> vector<16x16xf32>
    %cst_23 = arith.constant dense<0xFF800000> : vector<16xf32>
    %50 = vector.multi_reduction <maximumf>, %49, %cst_23 [1] : vector<16x16xf32> to vector<16xf32>
    %51 = vector.shape_cast %50 : vector<16xf32> to vector<16x1xf32>
    %52 = vector.broadcast %51 : vector<16x1xf32> to vector<16x16xf32>
    %53 = arith.subf %49, %52 : vector<16x16xf32>
    %54 = math.exp %53 : vector<16x16xf32>
    %55 = arith.truncf %54 : vector<16x16xf32> to vector<16x16xbf16>
    %cst_24 = arith.constant dense<0.000000e+00> : vector<16x128xf32>
    %56 = tpu.matmul %55, %48, %cst_24 {dimension_numbers = #tpu.dot_dimension_numbers<[1], [0], [0], [1], [0, 0, 1, 1], [], []>} : vector<16x16xbf16>, vector<16x128xbf16>, vector<16x128xf32> -> vector<16x128xf32>
    %cst_25 = arith.constant dense<0.000000e+00> : vector<16xf32>
    %57 = vector.multi_reduction <add>, %54, %cst_25 [1] : vector<16x16xf32> to vector<16xf32>
    %58 = vector.shape_cast %57 : vector<16xf32> to vector<16x1xf32>
    %59 = tpu.reciprocal %58 {approx = true} : vector<16x1xf32> -> vector<16x1xf32>
    %60 = vector.broadcast %59 : vector<16x1xf32> to vector<16x128xf32>
    %61 = arith.mulf %56, %60 : vector<16x128xf32>
    %62 = arith.truncf %61 : vector<16x128xf32> to vector<16x128xbf16>
    %63 = vector.extract_strided_slice %15 {offsets = [0, 0], sizes = [128, 128], strides = [1, 1]} : vector<256x128xbf16> to vector<128x128xbf16>
    %cst_26 = arith.constant dense<0.000000e+00> : vector<16x128xf32>
    %64 = tpu.matmul %62, %63, %cst_26 {dimension_numbers = #tpu.dot_dimension_numbers<[1], [0], [0], [1], [0, 0, 1, 1], [], []>} : vector<16x128xbf16>, vector<128x128xbf16>, vector<16x128xf32> -> vector<16x128xf32>
    %65 = vector.extract_strided_slice %45 {offsets = [0, 128], sizes = [16, 128], strides = [1, 1]} : vector<32x768xbf16> to vector<16x128xbf16>
    %66 = vector.extract_strided_slice %45 {offsets = [0, 384], sizes = [16, 128], strides = [1, 1]} : vector<32x768xbf16> to vector<16x128xbf16>
    %67 = vector.extract_strided_slice %45 {offsets = [0, 640], sizes = [16, 128], strides = [1, 1]} : vector<32x768xbf16> to vector<16x128xbf16>
    %cst_27 = arith.constant dense<0.000000e+00> : vector<16x16xf32>
    %68 = tpu.matmul %65, %66, %cst_27 {dimension_numbers = #tpu.dot_dimension_numbers<[1], [1], [0], [0], [0, 0, 1, 0], [], []>} : vector<16x128xbf16>, vector<16x128xbf16>, vector<16x16xf32> -> vector<16x16xf32>
    %cst_28 = arith.constant dense<0xFF800000> : vector<16xf32>
    %69 = vector.multi_reduction <maximumf>, %68, %cst_28 [1] : vector<16x16xf32> to vector<16xf32>
    %70 = vector.shape_cast %69 : vector<16xf32> to vector<16x1xf32>
    %71 = vector.broadcast %70 : vector<16x1xf32> to vector<16x16xf32>
    %72 = arith.subf %68, %71 : vector<16x16xf32>
    %73 = math.exp %72 : vector<16x16xf32>
    %74 = arith.truncf %73 : vector<16x16xf32> to vector<16x16xbf16>
    %cst_29 = arith.constant dense<0.000000e+00> : vector<16x128xf32>
    %75 = tpu.matmul %74, %67, %cst_29 {dimension_numbers = #tpu.dot_dimension_numbers<[1], [0], [0], [1], [0, 0, 1, 1], [], []>} : vector<16x16xbf16>, vector<16x128xbf16>, vector<16x128xf32> -> vector<16x128xf32>
    %cst_30 = arith.constant dense<0.000000e+00> : vector<16xf32>
    %76 = vector.multi_reduction <add>, %73, %cst_30 [1] : vector<16x16xf32> to vector<16xf32>
    %77 = vector.shape_cast %76 : vector<16xf32> to vector<16x1xf32>
    %78 = tpu.reciprocal %77 {approx = true} : vector<16x1xf32> -> vector<16x1xf32>
    %79 = vector.broadcast %78 : vector<16x1xf32> to vector<16x128xf32>
    %80 = arith.mulf %75, %79 : vector<16x128xf32>
    %81 = arith.truncf %80 : vector<16x128xf32> to vector<16x128xbf16>
    %82 = vector.extract_strided_slice %15 {offsets = [128, 0], sizes = [128, 128], strides = [1, 1]} : vector<256x128xbf16> to vector<128x128xbf16>
    %cst_31 = arith.constant dense<0.000000e+00> : vector<16x128xf32>
    %83 = tpu.matmul %81, %82, %cst_31 {dimension_numbers = #tpu.dot_dimension_numbers<[1], [0], [0], [1], [0, 0, 1, 1], [], []>} : vector<16x128xbf16>, vector<128x128xbf16>, vector<16x128xf32> -> vector<16x128xf32>
    %84 = arith.addf %64, %83 : vector<16x128xf32>
    %85 = vector.extract_strided_slice %20 {offsets = [0, 0], sizes = [16, 128], strides = [1, 1]} : vector<32x128xf32> to vector<16x128xf32>
    %86 = arith.addf %85, %84 : vector<16x128xf32>
    %87 = vector.broadcast %7 : vector<1x128xf32> to vector<16x128xf32>
    %88 = arith.addf %86, %87 : vector<16x128xf32>
    %c0_32 = arith.constant 0 : index
    %c0_33 = arith.constant 0 : index
    %89 = vector.load %arg7[%c0_32, %c0_33] : memref<32x128xf32, #tpu.memory_space<vmem>>, vector<16x128xf32>
    tpu.vector_store %arg7[%c0_32, %c0_33], %88 {strides = array<i32>} : memref<32x128xf32, #tpu.memory_space<vmem>>, vector<16x128xf32>,
    %90 = vector.extract_strided_slice %45 {offsets = [16, 0], sizes = [16, 128], strides = [1, 1]} : vector<32x768xbf16> to vector<16x128xbf16>
    %91 = vector.extract_strided_slice %45 {offsets = [16, 256], sizes = [16, 128], strides = [1, 1]} : vector<32x768xbf16> to vector<16x128xbf16>
    %92 = vector.extract_strided_slice %45 {offsets = [16, 512], sizes = [16, 128], strides = [1, 1]} : vector<32x768xbf16> to vector<16x128xbf16>
    %cst_34 = arith.constant dense<0.000000e+00> : vector<16x16xf32>
    %93 = tpu.matmul %90, %91, %cst_34 {dimension_numbers = #tpu.dot_dimension_numbers<[1], [1], [0], [0], [0, 0, 1, 0], [], []>} : vector<16x128xbf16>, vector<16x128xbf16>, vector<16x16xf32> -> vector<16x16xf32>
    %cst_35 = arith.constant dense<0xFF800000> : vector<16xf32>
    %94 = vector.multi_reduction <maximumf>, %93, %cst_35 [1] : vector<16x16xf32> to vector<16xf32>
    %95 = vector.shape_cast %94 : vector<16xf32> to vector<16x1xf32>
    %96 = vector.broadcast %95 : vector<16x1xf32> to vector<16x16xf32>
    %97 = arith.subf %93, %96 : vector<16x16xf32>
    %98 = math.exp %97 : vector<16x16xf32>
    %99 = arith.truncf %98 : vector<16x16xf32> to vector<16x16xbf16>
    %cst_36 = arith.constant dense<0.000000e+00> : vector<16x128xf32>
    %100 = tpu.matmul %99, %92, %cst_36 {dimension_numbers = #tpu.dot_dimension_numbers<[1], [0], [0], [1], [0, 0, 1, 1], [], []>} : vector<16x16xbf16>, vector<16x128xbf16>, vector<16x128xf32> -> vector<16x128xf32>
    %cst_37 = arith.constant dense<0.000000e+00> : vector<16xf32>
    %101 = vector.multi_reduction <add>, %98, %cst_37 [1] : vector<16x16xf32> to vector<16xf32>
    %102 = vector.shape_cast %101 : vector<16xf32> to vector<16x1xf32>
    %103 = tpu.reciprocal %102 {approx = true} : vector<16x1xf32> -> vector<16x1xf32>
    %104 = vector.broadcast %103 : vector<16x1xf32> to vector<16x128xf32>
    %105 = arith.mulf %100, %104 : vector<16x128xf32>
    %106 = arith.truncf %105 : vector<16x128xf32> to vector<16x128xbf16>
    %107 = vector.extract_strided_slice %15 {offsets = [0, 0], sizes = [128, 128], strides = [1, 1]} : vector<256x128xbf16> to vector<128x128xbf16>
    %cst_38 = arith.constant dense<0.000000e+00> : vector<16x128xf32>
    %108 = tpu.matmul %106, %107, %cst_38 {dimension_numbers = #tpu.dot_dimension_numbers<[1], [0], [0], [1], [0, 0, 1, 1], [], []>} : vector<16x128xbf16>, vector<128x128xbf16>, vector<16x128xf32> -> vector<16x128xf32>
    %109 = vector.extract_strided_slice %45 {offsets = [16, 128], sizes = [16, 128], strides = [1, 1]} : vector<32x768xbf16> to vector<16x128xbf16>
    %110 = vector.extract_strided_slice %45 {offsets = [16, 384], sizes = [16, 128], strides = [1, 1]} : vector<32x768xbf16> to vector<16x128xbf16>
    %111 = vector.extract_strided_slice %45 {offsets = [16, 640], sizes = [16, 128], strides = [1, 1]} : vector<32x768xbf16> to vector<16x128xbf16>
    %cst_39 = arith.constant dense<0.000000e+00> : vector<16x16xf32>
    %112 = tpu.matmul %109, %110, %cst_39 {dimension_numbers = #tpu.dot_dimension_numbers<[1], [1], [0], [0], [0, 0, 1, 0], [], []>} : vector<16x128xbf16>, vector<16x128xbf16>, vector<16x16xf32> -> vector<16x16xf32>
    %cst_40 = arith.constant dense<0xFF800000> : vector<16xf32>
    %113 = vector.multi_reduction <maximumf>, %112, %cst_40 [1] : vector<16x16xf32> to vector<16xf32>
    %114 = vector.shape_cast %113 : vector<16xf32> to vector<16x1xf32>
    %115 = vector.broadcast %114 : vector<16x1xf32> to vector<16x16xf32>
    %116 = arith.subf %112, %115 : vector<16x16xf32>
    %117 = math.exp %116 : vector<16x16xf32>
    %118 = arith.truncf %117 : vector<16x16xf32> to vector<16x16xbf16>
    %cst_41 = arith.constant dense<0.000000e+00> : vector<16x128xf32>
    %119 = tpu.matmul %118, %111, %cst_41 {dimension_numbers = #tpu.dot_dimension_numbers<[1], [0], [0], [1], [0, 0, 1, 1], [], []>} : vector<16x16xbf16>, vector<16x128xbf16>, vector<16x128xf32> -> vector<16x128xf32>
    %cst_42 = arith.constant dense<0.000000e+00> : vector<16xf32>
    %120 = vector.multi_reduction <add>, %117, %cst_42 [1] : vector<16x16xf32> to vector<16xf32>
    %121 = vector.shape_cast %120 : vector<16xf32> to vector<16x1xf32>
    %122 = tpu.reciprocal %121 {approx = true} : vector<16x1xf32> -> vector<16x1xf32>
    %123 = vector.broadcast %122 : vector<16x1xf32> to vector<16x128xf32>
    %124 = arith.mulf %119, %123 : vector<16x128xf32>
    %125 = arith.truncf %124 : vector<16x128xf32> to vector<16x128xbf16>
    %126 = vector.extract_strided_slice %15 {offsets = [128, 0], sizes = [128, 128], strides = [1, 1]} : vector<256x128xbf16> to vector<128x128xbf16>
    %cst_43 = arith.constant dense<0.000000e+00> : vector<16x128xf32>
    %127 = tpu.matmul %125, %126, %cst_43 {dimension_numbers = #tpu.dot_dimension_numbers<[1], [0], [0], [1], [0, 0, 1, 1], [], []>} : vector<16x128xbf16>, vector<128x128xbf16>, vector<16x128xf32> -> vector<16x128xf32>
    %128 = arith.addf %108, %127 : vector<16x128xf32>
    %129 = vector.extract_strided_slice %20 {offsets = [16, 0], sizes = [16, 128], strides = [1, 1]} : vector<32x128xf32> to vector<16x128xf32>
    %130 = arith.addf %129, %128 : vector<16x128xf32>
    %131 = vector.broadcast %7 : vector<1x128xf32> to vector<16x128xf32>
    %132 = arith.addf %130, %131 : vector<16x128xf32>
    %c16 = arith.constant 16 : index
    %c0_44 = arith.constant 0 : index
    %133 = vector.load %arg7[%c16, %c0_44] : memref<32x128xf32, #tpu.memory_space<vmem>>, vector<16x128xf32>
    tpu.vector_store %arg7[%c16, %c0_44], %132 {strides = array<i32>} : memref<32x128xf32, #tpu.memory_space<vmem>>, vector<16x128xf32>,
    %c0_45 = arith.constant 0 : index
    %c0_46 = arith.constant 0 : index
    %134 = vector.load %arg7[%c0_45, %c0_46] : memref<32x128xf32, #tpu.memory_space<vmem>>, vector<32x128xf32>
    %cst_47 = arith.constant dense<0.000000e+00> : vector<32xf32>
    %135 = vector.multi_reduction <add>, %134, %cst_47 [1] : vector<32x128xf32> to vector<32xf32>
    %136 = vector.shape_cast %135 : vector<32xf32> to vector<32x1xf32>
    %cst_48 = arith.constant 1.280000e+02 : f32
    %137 = vector.broadcast %cst_48 : f32 to vector<32x1xf32>
    %138 = arith.divf %136, %137 : vector<32x1xf32>
    %139 = arith.mulf %134, %134 : vector<32x128xf32>
    %cst_49 = arith.constant dense<0.000000e+00> : vector<32xf32>
    %140 = vector.multi_reduction <add>, %139, %cst_49 [1] : vector<32x128xf32> to vector<32xf32>
    %141 = vector.shape_cast %140 : vector<32xf32> to vector<32x1xf32>
    %cst_50 = arith.constant 1.280000e+02 : f32
    %142 = vector.broadcast %cst_50 : f32 to vector<32x1xf32>
    %143 = arith.divf %141, %142 : vector<32x1xf32>
    %144 = vector.broadcast %138 : vector<32x1xf32> to vector<32x128xf32>
    %145 = arith.subf %134, %144 : vector<32x128xf32>
    %146 = arith.mulf %138, %138 : vector<32x1xf32>
    %147 = arith.subf %143, %146 : vector<32x1xf32>
    %cst_51 = arith.constant 9.99999974E-6 : f32
    %148 = vector.broadcast %cst_51 : f32 to vector<32x1xf32>
    %149 = arith.addf %147, %148 : vector<32x1xf32>
    %150 = math.rsqrt %149 : vector<32x1xf32>
    %151 = vector.broadcast %150 : vector<32x1xf32> to vector<32x128xf32>
    %152 = arith.mulf %145, %151 : vector<32x128xf32>
    %153 = vector.broadcast %8 : vector<1x128xf32> to vector<32x128xf32>
    %154 = arith.mulf %152, %153 : vector<32x128xf32>
    %155 = vector.broadcast %9 : vector<1x128xf32> to vector<32x128xf32>
    %156 = arith.addf %154, %155 : vector<32x128xf32>
    %157 = arith.truncf %156 : vector<32x128xf32> to vector<32x128xbf16>
    %cst_52 = arith.constant dense<0.000000e+00> : vector<32x256xf32>
    %158 = tpu.matmul %157, %17, %cst_52 {dimension_numbers = #tpu.dot_dimension_numbers<[1], [0], [0], [1], [0, 0, 1, 1], [], []>} : vector<32x128xbf16>, vector<128x256xbf16>, vector<32x256xf32> -> vector<32x256xf32>
    %159 = vector.broadcast %10 : vector<1x256xf32> to vector<32x256xf32>
    %160 = arith.addf %158, %159 : vector<32x256xf32>
    %cst_53 = arith.constant 5.000000e-01 : f32
    %161 = vector.broadcast %cst_53 : f32 to vector<32x256xf32>
    %162 = arith.mulf %161, %160 : vector<32x256xf32>
    %cst_54 = arith.constant 4.471500e-02 : f32
    %163 = vector.broadcast %cst_54 : f32 to vector<32x256xf32>
    %164 = arith.mulf %163, %160 : vector<32x256xf32>
    %165 = arith.mulf %164, %160 : vector<32x256xf32>
    %166 = arith.mulf %165, %160 : vector<32x256xf32>
    %167 = arith.addf %160, %166 : vector<32x256xf32>
    %cst_55 = arith.constant 0.797884583 : f32
    %168 = vector.broadcast %cst_55 : f32 to vector<32x256xf32>
    %169 = arith.mulf %168, %167 : vector<32x256xf32>
    %170 = math.tanh %169 : vector<32x256xf32>
    %cst_56 = arith.constant 1.000000e+00 : f32
    %171 = vector.broadcast %cst_56 : f32 to vector<32x256xf32>
    %172 = arith.addf %171, %170 : vector<32x256xf32>
    %173 = arith.mulf %162, %172 : vector<32x256xf32>
    %174 = arith.truncf %173 : vector<32x256xf32> to vector<32x256xbf16>
    %cst_57 = arith.constant dense<0.000000e+00> : vector<32x128xf32>
    %175 = tpu.matmul %174, %19, %cst_57 {dimension_numbers = #tpu.dot_dimension_numbers<[1], [0], [0], [1], [0, 0, 1, 1], [], []>} : vector<32x256xbf16>, vector<256x128xbf16>, vector<32x128xf32> -> vector<32x128xf32>
    %176 = vector.broadcast %11 : vector<1x128xf32> to vector<32x128xf32>
    %177 = arith.addf %175, %176 : vector<32x128xf32>
    %178 = arith.addf %134, %177 : vector<32x128xf32>
    %c0_58 = arith.constant 0 : index
    %c0_59 = arith.constant 0 : index
    %179 = vector.load %arg7[%c0_58, %c0_59] : memref<32x128xf32, #tpu.memory_space<vmem>>, vector<32x128xf32>
    tpu.vector_store %arg7[%c0_58, %c0_59], %178 {strides = array<i32>} : memref<32x128xf32, #tpu.memory_space<vmem>>, vector<32x128xf32>,
    return
  }
  func.func @transform_0(%arg0: i32) -> (i32, i32) {
    %c0_i32 = arith.constant 0 : i32
    %c0_i32_0 = arith.constant 0 : i32
    %c0_i32_1 = arith.constant 0 : i32
    return %c0_i32, %c0_i32_0 : i32, i32
  }
  func.func @transform_1(%arg0: i32) -> (i32, i32, i32) {
    %c0_i32 = arith.constant 0 : i32
    %c0_i32_0 = arith.constant 0 : i32
    %c0_i32_1 = arith.constant 0 : i32
    return %arg0, %c0_i32, %c0_i32_0 : i32, i32, i32
  }
  func.func @transform_2(%arg0: i32) -> (i32, i32, i32) {
    %c0_i32 = arith.constant 0 : i32
    %c0_i32_0 = arith.constant 0 : i32
    %c0_i32_1 = arith.constant 0 : i32
    return %arg0, %c0_i32, %c0_i32_0 : i32, i32, i32
  }
  func.func @transform_3(%arg0: i32) -> (i32, i32, i32) {
    %c0_i32 = arith.constant 0 : i32
    %c0_i32_0 = arith.constant 0 : i32
    %c0_i32_1 = arith.constant 0 : i32
    return %arg0, %c0_i32, %c0_i32_0 : i32, i32, i32
  }
  func.func @transform_4(%arg0: i32) -> (i32, i32, i32) {
    %c0_i32 = arith.constant 0 : i32
    %c0_i32_0 = arith.constant 0 : i32
    %c0_i32_1 = arith.constant 0 : i32
    return %arg0, %c0_i32, %c0_i32_0 : i32, i32, i32
  }
  func.func @transform_5(%arg0: i32) -> (i32, i32, i32) {
    %c0_i32 = arith.constant 0 : i32
    %c0_i32_0 = arith.constant 0 : i32
    %c0_i32_1 = arith.constant 0 : i32
    return %arg0, %c0_i32, %c0_i32_0 : i32, i32, i32
  }
  func.func @transform_6(%arg0: i32) -> (i32, i32) {
    %c0_i32 = arith.constant 0 : i32
    %c0_i32_0 = arith.constant 0 : i32
    %c0_i32_1 = arith.constant 0 : i32
    return %c0_i32, %c0_i32_0 : i32, i32
  }
}

</mosaic_0001>

<bundles_post_ra>
// kernel: tpu_custom_call.1
= control target key start
LH: loop header
LB: loop body
LE: loop exit
PB: predicated region body
PF: predicated region fallthrough
CT: control target
= control target key end

     0   :  { %s3972_s0 = inlined_call_operand.hbm [shape: f32[32,128], index: 0, kind: input, shape index: {}]   ;;  %s3973_s1 = inlined_call_operand.hbm [shape: f32[2,8,256], index: 1, kind: input, shape index: {}]   ;;  %s3974_s2 = inlined_call_operand.hbm [shape: bf16[2,128,768], index: 2, kind: input, shape index: {}]   ;;  %s3975_s3 = inlined_call_operand.hbm [shape: bf16[2,256,128], index: 3, kind: input, shape index: {}]   ;;  %s3976_s4 = inlined_call_operand.hbm [shape: bf16[2,128,256], index: 4, kind: input, shape index: {}]   ;;  %s3977_s5 = inlined_call_operand.hbm [shape: bf16[2,256,128], index: 5, kind: input, shape index: {}]   ;;  %s3978_s6 = inlined_call_operand.hbm [shape: f32[32,128], index: 6, kind: output, shape index: {}]  }
   0x1   :  { %3985 = sst [smem:[#allocation21_spill]] %s3973_s1 }
   0x2   :  { %3986 = sst [smem:[#allocation22_spill]] %s3975_s3 }
   0x3   :  { %11 = vsyncpa [#allocation3], 0 }
   0x4   :  { %12 = vsyncpa [#allocation6], 0 }
   0x5   :  { %14 = vsyncpa [#allocation6 + $0x1], 0 }
   0x6   :  { %15 = vsyncpa [#allocation9], 0 }
   0x7   :  { %17 = vsyncpa [#allocation9 + $0x1], 0 }
   0x8   :  { %18 = vsyncpa [#allocation12], 0 }
   0x9   :  { %20 = vsyncpa [#allocation12 + $0x1], 0 }
   0xa   :  { %21 = vsyncpa [#allocation4], 0  ;;  %s3295_s21 = smov 0   ;;  %s3297_s22 = smov 0  }
   0xb   :  { %s3299_s23 = smov 0   ;;  %s3301_s24 = smov 0  }
   0xc LB: > { %3987 = sst [smem:[#allocation19_spill]] %s3236_s23  ;;  %s3316_s25 = sadd.s32 1, %s3240_s24   ;;  %s3240_s24 = sphi %s3301_s24, %s4007_s24   ;;  %s3236_s23 = sphi %s3299_s23, %s4004_s23   ;;  %s3232_s22 = sphi %s3297_s22, %s4006_s22   ;;  %s3228_s21 = sphi %s3295_s21, %s4005_s21  }
   0xd   : > { %s55_s26 = sadd.s32 1, %s3236_s23  ;;  %s52_s27 = ssub.s32 %s3240_s24, %s3316_s25 }
   0xe   : > { %p62_p0 = scmp.ne.s32.totalorder %s3236_s23, %s3232_s22  ;;  %p53_p1 = scmp.eq.s32.totalorder %s52_s27, 0 }
   0xf   : > { %p63_p2 = scmp.eq.s32.totalorder %s3240_s24, 0  ;;  %p2754_p3 = scmp.lt.s32.totalorder %s3240_s24, 2 }
  0x10   : > { %s3326_s28 = scalar_select %p53_p1, %s3236_s23, %s55_s26  }
  0x11   : > { %p64_p4 = por %p63_p2, %p62_p0  ;;  %s230_s29 = sand.u32 1, %s3240_s24  }
  0x12   : > { %3988 = sst [smem:[#allocation20_spill]] %s3326_s28  ;;  %s3330_s30 = sand.u32 1, %s3236_s23  }
  0x13   : > { %s2376_s7 = sshll.u32 %s3330_s30, 4  ;;  %s2500_s8 = sshll.u32 %s3240_s24, 8 }
  0x14   : > { %s3989_s1 = sld [smem:[#allocation21_spill]]  ;;  %s234_s12 = scalar_lea.vmem [#allocation5], %s2376_s7 }
  0x15   : > { %s242_s13 = sshll.u32 %s234_s12, 4  ;;  %p3339_p5 = pnand %p2754_p3, %p64_p4  ;;  %s243_s13 = int_to_ptr.vmem [resolvable:$true] %s242_s13 }
  0x16   : > { %s2712_s15 = smul.u32 384, %s3330_s30  ;;  %s3346_s16 = scalar_lea.sflag [#allocation6], %s230_s29 }
  0x17   : > { %p3352_p7 = pneg %p3339_p5 }
  0x1a   : > { %s3337_s11 = scalar_lea.hbm %s3989_s1, %s2500_s8  ;;  %s3005_s26 = scalar_lea.hbm %s3989_s1, 512 }
  0x1b   : > { %s3000_s17 = scalar_lea.hbm %s3337_s11, 256  ;;  %p3006_p10 = scmp.lt.s32.totalorder %s3337_s11, %s3989_s1 }
  0x1c   : > { %p3001_p6 = scmp.ne.s32.totalorder %s3337_s11, %s3000_s17  ;;  %p3007_p11 = scmp.lt.s32.totalorder %s3005_s26, %s3000_s17 }
  0x1e   : > { %p3003_p8 = pnand %p3352_p7, %p3001_p6  ;;  %p3008_p12 = por %p3007_p11, %p3006_p10 }
  0x20   : > { %p3004_p9 = pneg %p3003_p8 }
  0x22   : > { %p3009_p13 = pnand %p3008_p12, %p3004_p9 }
  0x24   : > { %3012 = shalt.err (!%p3009_p13)
}
  0x25   : > { %s3013_s8 = scalar_lea.vmem %s243_s13, 256  ;;  %s3242_s9 = smov [#allocation5]  }
  0x26   : > { %p3014_p0 = scmp.ne.s32.totalorder %s243_s13, %s3013_s8  ;;  %s3018_s10 = sshll.u32 %s3242_s9, 4  ;;  %s3019_s10 = int_to_ptr.vmem [resolvable:$false] %s3018_s10 }
  0x27   : > { %s3020_s12 = scalar_lea.vmem %s3019_s10, 512  ;;  %p3021_p3 = scmp.lt.s32.totalorder %s243_s13, %s3019_s10 }
  0x28   : > { %p3016_p1 = pnand %p3014_p0, %p3352_p7  ;;  %p3022_p4 = scmp.lt.s32.totalorder %s3020_s12, %s3013_s8 }
  0x2a   : > { %p3017_p2 = pneg %p3016_p1  ;;  %p3023_p6 = por %p3022_p4, %p3021_p3 }
  0x2c   : > { %p3024_p8 = pnand %p3023_p6, %p3017_p2 }
  0x2e   : > { %3027 = shalt.err (!%p3024_p8)
}
  0x2f   : > { %2740 = dma.hbm_to_vmem [thread:$0]  (!%p3339_p5), %s3337_s11, 256, %s243_s13, %s3346_s16  }
  0x30   : > { %s3372_s17 = sshll.u32 %s3330_s30, 7  ;;  %s3375_s19 = sshll.u32 %s3240_s24, 11 }
  0x31   : > { %s3992_s3 = sld [smem:[#allocation22_spill]]  ;;  %s274_s7 = scalar_lea.vmem [#allocation8], %s3372_s17 }
  0x32   : > { %s281_s8 = sshll.u32 %s274_s7, 4  ;;  %s3388_s11 = scalar_lea.sflag [#allocation9], %s230_s29  ;;  %s3384_s8 = int_to_ptr.vmem [resolvable:$true] %s281_s8 }
  0x37   : > { %s3381_s27 = scalar_lea.hbm %s3992_s3, %s3375_s19  ;;  %s3033_s12 = scalar_lea.hbm %s3992_s3, 4096 }
  0x38   : > { %s3028_s13 = scalar_lea.hbm %s3381_s27, 2048  ;;  %p3034_p12 = scmp.lt.s32.totalorder %s3381_s27, %s3992_s3 }
  0x39   : > { %p3029_p9 = scmp.ne.s32.totalorder %s3381_s27, %s3028_s13  ;;  %p3035_p13 = scmp.lt.s32.totalorder %s3033_s12, %s3028_s13 }
  0x3b   : > { %p3031_p10 = pnand %p3029_p9, %p3352_p7  ;;  %p3036_p0 = por %p3035_p13, %p3034_p12 }
  0x3d   : > { %p3032_p11 = pneg %p3031_p10 }
  0x3f   : > { %p3037_p1 = pnand %p3036_p0, %p3032_p11 }
  0x41   : > { %3040 = shalt.err (!%p3037_p1)
}
  0x42   : > { %s3041_s29 = scalar_lea.vmem %s3384_s8, 2048  ;;  %s3243_s7 = smov [#allocation8]  }
  0x43   : > { %p3042_p2 = scmp.ne.s32.totalorder %s3384_s8, %s3041_s29  ;;  %s3046_s9 = sshll.u32 %s3243_s7, 4  ;;  %s3047_s9 = int_to_ptr.vmem [resolvable:$false] %s3046_s9 }
  0x44   : > { %s3048_s10 = scalar_lea.vmem %s3047_s9, 4096  ;;  %p3049_p6 = scmp.lt.s32.totalorder %s3384_s8, %s3047_s9 }
  0x45   : > { %p3044_p3 = pnand %p3042_p2, %p3352_p7  ;;  %p3050_p8 = scmp.lt.s32.totalorder %s3048_s10, %s3041_s29 }
  0x47   : > { %p3045_p4 = pneg %p3044_p3  ;;  %p3051_p9 = por %p3050_p8, %p3049_p6 }
  0x49   : > { %p3052_p10 = pnand %p3051_p9, %p3045_p4 }
  0x4b   : > { %3055 = shalt.err (!%p3052_p10)
}
  0x4c   : > { %s3979_s13 = smov 64   ;;  %s3980_s12 = smov 4  }
  0x4d   : > { %2746 = dma.hbm_to_vmem [thread:$0]  (!%p3339_p5), %s3381_s27, 2048, %s3384_s8, %s3388_s11, %s3979_s13, %s3979_s13, %s3980_s12  }
  0x4e   : > { %s3415_s20 = sadd.s32 4294967295, %s3240_s24   ;;  %p68_p12 = scmp.ne.s32.totalorder %s3232_s22, %s3228_s21 }
  0x4f   : > { %p3982_p11 = scmp.eq.s32.totalorder %s3415_s20, 0  ;;  %p2373_p13 = scmp.ge.s32.totalorder %s3240_s24, 1 }
  0x50   : > { %p204_p0 = scmp.lt.s32.totalorder %s3240_s24, 3  ;;  %s3246_s27 = smov [#allocation2]  }
  0x51   : > { %p3425_p2 = por %p3982_p11, %p68_p12  ;;  %s216_s8 = sshll.u32 %s3246_s27, 4  ;;  %s217_s8 = int_to_ptr.vmem [resolvable:$true] %s216_s8 }
  0x52   : > { %p3429_p3 = pnand %p2373_p13, %p204_p0  ;;  %s2713_s7 = smul.u32 6144, %s3240_s24 }
  0x53   : > { %s3993_s26 = scalar_select %p3425_p2, 1, 0 }
  0x54   : > { %s3994_s29 = scalar_select %p3429_p3, 1, 0 }
  0x55   : > { %p2733_p4 = pneg %p3429_p3  ;;  %s253_s9 = scalar_lea.vmem [#allocation7], %s2712_s15 }
  0x56   : > { %s260_s10 = sshll.u32 %s253_s9, 4  ;;  %s3447_s1 = scalar_lea.hbm %s3974_s2, %s2713_s7  ;;  %s3449_s10 = int_to_ptr.vmem [resolvable:$true] %s260_s10 }
  0x57   : > { %p3438_p6 = pnand %p2733_p4, %p3982_p11  ;;  %s3067_s27 = scalar_lea.vmem %s217_s8, 512 }
  0x58   : > { %p3068_p9 = scmp.ne.s32.totalorder %s217_s8, %s3067_s27  ;;  %p3075_p13 = scmp.lt.s32.totalorder %s217_s8, %s217_s8 }
  0x59   : > { %p3058_p8 = pneg %p3438_p6  ;;  %p3076_p0 = scmp.lt.s32.totalorder %s3067_s27, %s3067_s27 }
  0x5b   : > { %p3070_p10 = pnand %p3068_p9, %p3058_p8  ;;  %p3077_p4 = por %p3076_p0, %p3075_p13 }
  0x5d   : > { %p3071_p12 = pneg %p3070_p10 }
  0x5f   : > { %p3078_p1 = pnand %p3077_p4, %p3071_p12 }
  0x61   : > { %3081 = shalt.err (!%p3078_p1)
}
  0x62   : > { %s3247_s24 = smov 128   ;;  %s3248_s15 = smov 8  }
  0x63   : > { %2736 = dma.hbm_to_vmem [thread:$0]  (!%p3438_p6), %s3972_s0, 512, %s217_s8, [#allocation3], %s3247_s24, %s3247_s24, %s3248_s15  }
  0x64   : > { %s3082_s7 = scalar_lea.hbm %s3447_s1, 6144  ;;  %s3087_s3 = scalar_lea.hbm %s3974_s2, 12288 }
  0x65   : > { %p3083_p8 = scmp.ne.s32.totalorder %s3447_s1, %s3082_s7  ;;  %p3088_p10 = scmp.lt.s32.totalorder %s3447_s1, %s3974_s2 }
  0x66   : > { %p3089_p12 = scmp.lt.s32.totalorder %s3087_s3, %s3082_s7 }
  0x67   : > { %p3085_p9 = pnand %p3083_p8, %p3352_p7 }
  0x68   : > { %p3090_p13 = por %p3089_p12, %p3088_p10 }
  0x69   : > { %p3086_p1 = pneg %p3085_p9 }
  0x6b   : > { %p3091_p0 = pnand %p3090_p13, %p3086_p1 }
  0x6d   : > { %3094 = shalt.err (!%p3091_p0)
}
  0x6e   : > { %s3095_s8 = scalar_lea.vmem %s3449_s10, 6144  ;;  %s3249_s21 = smov [#allocation7]  }
  0x6f   : > { %p3096_p6 = scmp.ne.s32.totalorder %s3449_s10, %s3095_s8  ;;  %s3100_s13 = sshll.u32 %s3249_s21, 4  ;;  %s3101_s13 = int_to_ptr.vmem [resolvable:$false] %s3100_s13 }
  0x70   : > { %s3102_s12 = scalar_lea.vmem %s3101_s13, 12288  ;;  %p3103_p9 = scmp.lt.s32.totalorder %s3449_s10, %s3101_s13 }
  0x71   : > { %p3098_p4 = pnand %p3096_p6, %p3352_p7  ;;  %p3104_p11 = scmp.lt.s32.totalorder %s3102_s12, %s3095_s8 }
  0x73   : > { %p3099_p8 = pneg %p3098_p4  ;;  %p3105_p2 = por %p3104_p11, %p3103_p9 }
  0x75   : > { %p3106_p3 = pnand %p3105_p2, %p3099_p8 }
  0x77   : > { %3109 = shalt.err (!%p3106_p3)
}
  0x78   : > { %s3250_s3 = smov 384   ;;  %s3251_s23 = smov 24  }
  0x79   : > { %2743 = dma.hbm_to_vmem [thread:$0]  (!%p3339_p5), %s3447_s1, 6144, %s3449_s10, %s3346_s16, %s3250_s3, %s3250_s3, %s3251_s23  }
  0x7a   : > { %s3486_s9 = scalar_lea.hbm %s3976_s4, %s3375_s19  ;;  %s295_s27 = scalar_lea.vmem [#allocation10], %s3372_s17 }
  0x7b   : > { %s302_s8 = sshll.u32 %s295_s27, 4  ;;  %s3110_s21 = scalar_lea.hbm %s3486_s9, 2048  ;;  %s303_s8 = int_to_ptr.vmem [resolvable:$true] %s302_s8 }
  0x7c   : > { %p3111_p11 = scmp.ne.s32.totalorder %s3486_s9, %s3110_s21  ;;  %s3115_s1 = scalar_lea.hbm %s3976_s4, 4096 }
  0x7d   : > { %p3116_p1 = scmp.lt.s32.totalorder %s3486_s9, %s3976_s4  ;;  %p3117_p10 = scmp.lt.s32.totalorder %s3115_s1, %s3110_s21 }
  0x7e   : > { %p3113_p2 = pnand %p3111_p11, %p3352_p7 }
  0x7f   : > { %p3118_p12 = por %p3117_p10, %p3116_p1 }
  0x80   : > { %p3114_p3 = pneg %p3113_p2 }
  0x82   : > { %p3119_p13 = pnand %p3118_p12, %p3114_p3 }
  0x84   : > { %3122 = shalt.err (!%p3119_p13)
}
  0x85   : > { %s3123_s3 = scalar_lea.vmem %s303_s8, 2048  ;;  %s3252_s23 = smov [#allocation10]  }
  0x86   : > { %p3124_p0 = scmp.ne.s32.totalorder %s303_s8, %s3123_s3  ;;  %s3128_s28 = sshll.u32 %s3252_s23, 4  ;;  %s3129_s28 = int_to_ptr.vmem [resolvable:$false] %s3128_s28 }
  0x87   : > { %s3130_s7 = scalar_lea.vmem %s3129_s28, 4096  ;;  %p3131_p8 = scmp.lt.s32.totalorder %s303_s8, %s3129_s28 }
  0x88   : > { %p3126_p6 = pnand %p3124_p0, %p3352_p7  ;;  %p3132_p9 = scmp.lt.s32.totalorder %s3130_s7, %s3123_s3 }
  0x8a   : > { %p3127_p4 = pneg %p3126_p6  ;;  %p3133_p11 = por %p3132_p9, %p3131_p8 }
  0x8c   : > { %p3134_p2 = pnand %p3133_p11, %p3127_p4 }
  0x8e   : > { %3137 = shalt.err (!%p3134_p2)
}
  0x8f   : > { %2749 = dma.hbm_to_vmem [thread:$0]  (!%p3339_p5), %s3486_s9, 2048, %s303_s8, %s3388_s11, %s3247_s24, %s3247_s24, %s3248_s15  }
  0x90   : > { %s3513_s13 = scalar_lea.hbm %s3977_s5, %s3375_s19  ;;  %s316_s12 = scalar_lea.vmem [#allocation11], %s3372_s17 }
  0x91   : > { %s323_s1 = sshll.u32 %s316_s12, 4  ;;  %s313_s16 = scalar_lea.sflag [#allocation12], %s3330_s30  ;;  %s3516_s1 = int_to_ptr.vmem [resolvable:$true] %s323_s1 }
  0x92   : > { %s3138_s10 = scalar_lea.hbm %s3513_s13, 2048  ;;  %s3143_s24 = scalar_lea.hbm %s3977_s5, 4096 }
  0x93   : > { %p3139_p3 = scmp.ne.s32.totalorder %s3513_s13, %s3138_s10  ;;  %p3144_p12 = scmp.lt.s32.totalorder %s3513_s13, %s3977_s5 }
  0x94   : > { %p3145_p13 = scmp.lt.s32.totalorder %s3143_s24, %s3138_s10 }
  0x95   : > { %p3141_p1 = pnand %p3139_p3, %p3352_p7 }
  0x96   : > { %p3146_p0 = por %p3145_p13, %p3144_p12 }
  0x97   : > { %p3142_p10 = pneg %p3141_p1 }
  0x99   : > { %p3147_p6 = pnand %p3146_p0, %p3142_p10 }
  0x9b   : > { %3150 = shalt.err (!%p3147_p6)
}
  0x9c   : > { %s3151_s30 = scalar_lea.vmem %s3516_s1, 2048  ;;  %s3253_s17 = smov [#allocation11]  }
  0x9d   : > { %p3152_p4 = scmp.ne.s32.totalorder %s3516_s1, %s3151_s30  ;;  %s3156_s9 = sshll.u32 %s3253_s17, 4  ;;  %s3157_s9 = int_to_ptr.vmem [resolvable:$false] %s3156_s9 }
  0x9e   : > { %s3158_s8 = scalar_lea.vmem %s3157_s9, 4096  ;;  %p3159_p11 = scmp.lt.s32.totalorder %s3516_s1, %s3157_s9 }
  0x9f   : > { %p3154_p8 = pnand %p3152_p4, %p3352_p7  ;;  %p3160_p2 = scmp.lt.s32.totalorder %s3158_s8, %s3151_s30 }
  0xa1   : > { %p3155_p9 = pneg %p3154_p8  ;;  %p3161_p3 = por %p3160_p2, %p3159_p11 }
  0xa3   : > { %p3162_p1 = pnand %p3161_p3, %p3155_p9 }
  0xa5   : > { %3165 = shalt.err (!%p3162_p1)
}
  0xa6   : > { %s3996_s23 = smov 4   ;;  %s3997_s28 = smov 64  }
  0xa7   : > { %2752 = dma.hbm_to_vmem [thread:$0]  (!%p3339_p5), %s3513_s13, 2048, %s3516_s1, %s313_s16, %s3997_s28, %s3997_s28, %s3996_s23  }
  0xa8   : > { %p3998_p7 = scmp.ne.s32.totalorder %s3994_s29, 0 }
  0xa9   : > { %p3999_p10 = scmp.eq.s32.totalorder (!%p3998_p7), %s3415_s20, 0 }
  0xaa   : > { %335 = sbr.rel (%p3998_p7) target bundleno = 2893 (0xb4d), region = 44 }
  0xaf   : > { %3207 = dma.done.wait (%p3999_p10), [#allocation3], 512   ;;  %p4000_p12 = pmov %p3999_p10 }
  0xb0   : > { %s341_s18 = sand.u32 1, %s3415_s20   ;;  %s343_s14 = sand.u32 1, %s3232_s22  }
  0xb1   : > { %3209 = vsyncadd (%p4000_p12), [#allocation3], 4294966784  ;;  %s2391_s7 = sshll.u32 %s343_s14, 4  ;;  %s342_s27 = scalar_lea.sflag [#allocation6], %s341_s18 }
  0xb2   : > { %s3550_s21 = scalar_lea.vmem [#allocation5], %s2391_s7  ;;  %p4001_p13 = scmp.ne.s32.totalorder %s3993_s26, 0 }
  0xb4   : > { %3211 = dma.done.wait (%p4001_p13), %s342_s27, 6400  }
  0xb5   : > { %3213 = vsyncadd (%p4001_p13), %s342_s27, 4294960896  ;;  %s2714_s29 = smul.u32 384, %s343_s14  ;;  %s2392_s13 = sshll.u32 %s343_s14, 7 }
  0xb6   : > { %s360_s1 = scalar_lea.sflag [#allocation9], %s341_s18  ;;  %s3558_s16 = scalar_lea.vmem [#allocation8], %s2392_s13 }
  0xb7   : > { %s3556_s12 = scalar_lea.vmem [#allocation7], %s2714_s29 }
  0xb8   : > { %3215 = dma.done.wait (%p4001_p13), %s360_s1, 4096  }
  0xb9   : > { %3217 = vsyncadd (%p4001_p13), %s360_s1, 4294963200  ;;  %s3564_s10 = scalar_lea.vmem [#allocation10], %s2392_s13  ;;  %s378_s3 = scalar_lea.sflag [#allocation12], %s343_s14 }
  0xba   : > { %s3566_s11 = scalar_lea.vmem [#allocation11], %s2392_s13 }
  0xbb   : > { %3219 = dma.done.wait (%p4001_p13), %s378_s3, 2048  }
  0xbc   : > { %3221 = vsyncadd (%p4001_p13), %s378_s3, 4294965248  ;;  %p4002_p5 = scmp.ne.s32.totalorder %s3415_s20, 0 }
  0xbe   : > { %429 = sbr.rel (%p4002_p5) target bundleno = 198 (0xc6), region = 72 }
  0xc3   : > { %v430_v0 = vld [vmem:[#allocation2] sm:$0xff]  ;;  %v431_v1 = vld [vmem:[#allocation2 + $0x8] sm:$0xff]  ;;  %v432_v2 = vld [vmem:[#allocation2 + $0x10] sm:$0xff] }
  0xc4   : > { %434 = vst [vmem:[#allocation13] sm:$0xff] %v430_v0  ;;  %435 = vst [vmem:[#allocation13 + $0x8] sm:$0xff] %v431_v1  ;;  %v433_v3 = vld [vmem:[#allocation2 + $0x18] sm:$0xff] }
  0xc5   : > { %436 = vst [vmem:[#allocation13 + $0x10] sm:$0xff] %v432_v2  ;;  %437 = vst [vmem:[#allocation13 + $0x18] sm:$0xff] %v433_v3 }
  0xc6 PF: > { %v2803_v11 = vld [vmem:[%s3556_s12 + $0x154] ss:$24 sps:$4 sm:$0xff]   ;;  %v2805_v13 = vld [vmem:[%s3556_s12 + $0x150] ss:$24 sps:$4 sm:$0xff]   ;;  %v2809_v16 = vld [vmem:[%s3556_s12 + $0x124] ss:$24 sps:$4 sm:$0xff]   ;;  %v625_v1 = vlaneseq }
  0xc7   : > { %v2806_v14 = vld [vmem:[%s3556_s12 + $0x15c] ss:$24 sps:$4 sm:$0xff]   ;;  %883 = vmatprep.subr.bf16.mxu0 %v2803_v11  ;;  %v2808_v15 = vld [vmem:[%s3556_s12 + $0x158] ss:$24 sps:$4 sm:$0xff]   ;;  %v2812_v18 = vld [vmem:[%s3556_s12 + $0x12c] ss:$24 sps:$4 sm:$0xff]  }
  0xc8   : > { %884 = vmatpush1.bf16.msra.mxu0 %v2805_v13  ;;  %936 = vmatprep.subr.bf16.mxu1 %v2806_v14  ;;  %v2811_v17 = vld [vmem:[%s3556_s12 + $0x120] ss:$24 sps:$4 sm:$0xff]   ;;  %v2815_v20 = vld [vmem:[%s3556_s12 + $0xf4] ss:$24 sps:$4 sm:$0xff]   ;;  %v2817_v21 = vld [vmem:[%s3556_s12 + $0xf0] ss:$24 sps:$4 sm:$0xff]  }
  0xc9   : > { %937 = vmatpush1.bf16.msra.mxu1 %v2808_v15  ;;  %885 = vmatprep.subr.bf16.mxu0 %v2809_v16  ;;  %v2814_v19 = vld [vmem:[%s3556_s12 + $0x128] ss:$24 sps:$4 sm:$0xff]   ;;  %v2818_v22 = vld [vmem:[%s3556_s12 + $0xfc] ss:$24 sps:$4 sm:$0xff]   ;;  %v2820_v23 = vld [vmem:[%s3556_s12 + $0xf8] ss:$24 sps:$4 sm:$0xff]  }
  0xca   : > { %938 = vmatprep.subr.bf16.mxu1 %v2812_v18  ;;  %v2821_v24 = vld [vmem:[%s3556_s12 + $0xc4] ss:$24 sps:$4 sm:$0xff]   ;;  %v2823_v25 = vld [vmem:[%s3556_s12 + $0xc0] ss:$24 sps:$4 sm:$0xff]   ;;  %v2827_v28 = vld [vmem:[%s3556_s12 + $0x94] ss:$24 sps:$4 sm:$0xff]  }
  0xcb   : > { %v3574_v4 = vld [vmem:[#allocation13] sm:$0xff]  ;;  %v3576_v5 = vld [vmem:[#allocation13 + $0x8] sm:$0xff]  ;;  %v2830_v29 = vld [vmem:[%s3556_s12 + $0x9c] ss:$24 sps:$4 sm:$0xff]   ;;  %v3254_v41 = vmov 0   ;;  %vm3256_vm0 = vmmov 0  }
  0xcc   : > { %572 = vadd.xlane.f32.xlu0 %v3574_v4  ;;  %v585_v6 = vmul.f32 %v3574_v4, %v3574_v4  ;;  %v586_v7 = vmul.f32 %v3576_v5, %v3576_v5  ;;  %v3583_v8 = vld [vmem:[#allocation13 + $0x10] sm:$0xff]  ;;  %v3586_v9 = vld [vmem:[#allocation13 + $0x18] sm:$0xff]  ;;  %886 = vmatpush1.bf16.msra.mxu0 %v2811_v17  ;;  %v2824_v26 = vld [vmem:[%s3556_s12 + $0xcc] ss:$24 sps:$4 sm:$0xff]   ;;  %vm1095_vm1 = vcmask 130048   ;;  %s3257_s26 = smov [#allocation13]  }
  0xcd   : > { %v587_v10 = vmul.f32 %v3583_v8, %v3583_v8  ;;  %v588_v12 = vmul.f32 %v3586_v9, %v3586_v9  ;;  %939 = vmatpush1.bf16.msra.mxu1 %v2814_v19  ;;  %887 = vmatprep.subr.bf16.mxu0 %v2815_v20  ;;  %v2826_v27 = vld [vmem:[%s3556_s12 + $0xc8] ss:$24 sps:$4 sm:$0xff]   ;;  %v2833_v31 = vld [vmem:[%s3556_s12 + $0x64] ss:$24 sps:$4 sm:$0xff]   ;;  %v2832_v32 = vld [vmem:[%s3556_s12 + $0x98] ss:$24 sps:$4 sm:$0xff]  }
  0xce   : > { %589 = vadd.xlane.f32.xlu1 %v585_v6  ;;  %940 = vmatprep.subr.bf16.mxu1 %v2818_v22  ;;  %v2829_v30 = vld [vmem:[%s3556_s12 + $0x90] ss:$24 sps:$4 sm:$0xff]   ;;  %v2835_v33 = vld [vmem:[%s3556_s12 + $0x60] ss:$24 sps:$4 sm:$0xff]   ;;  %v2836_v34 = vld [vmem:[%s3556_s12 + $0x6c] ss:$24 sps:$4 sm:$0xff]  }
  0xcf   : > { %v2839_v35 = vld [vmem:[%s3556_s12 + $0x34] ss:$24 sps:$4 sm:$0xff]   ;;  %v2838_v36 = vld [vmem:[%s3556_s12 + $0x68] ss:$24 sps:$4 sm:$0xff]   ;;  %v2844_v39 = vld [vmem:[%s3556_s12 + $0x38] ss:$24 sps:$4 sm:$0xff]   ;;  %915 = vmatprep.mubr.bf16.mxu0 %v3254_v41  ;;  %968 = vmatprep.mubr.bf16.mxu1 %v3254_v41 }
  0xd0   : > { %574 = vadd.xlane.f32.xlu0 %v3576_v5  ;;  %888 = vmatpush1.bf16.msra.mxu0 %v2817_v21  ;;  %v2841_v37 = vld [vmem:[%s3556_s12 + $0x30] ss:$24 sps:$4 sm:$0xff]   ;;  %v2842_v38 = vld [vmem:[%s3556_s12 + $0x3c] ss:$24 sps:$4 sm:$0xff]   ;;  %v2848_v42 = vld [vmem:[%s3556_s12 + $0xc] ss:$24 sps:$4 sm:$0xff]  }
  0xd1   : > { %941 = vmatpush1.bf16.msra.mxu1 %v2820_v23  ;;  %889 = vmatprep.subr.bf16.mxu0 %v2821_v24  ;;  %v2845_v40 = vld [vmem:[%s3556_s12 + $0x4] ss:$24 sps:$4 sm:$0xff]   ;;  %v2847_v43 = vld [vmem:[%s3556_s12] ss:$24 sps:$4 sm:$0xff]   ;;  %s2221_s24 = sshll.u32 %s3257_s26, 4  ;;  %p2756_p0 = scmp.eq.s32.totalorder %s3415_s20, 1  ;;  %s2222_s24 = int_to_ptr.vmem [resolvable:$true] %s2221_s24 }
  0xd2   : > { %591 = vadd.xlane.f32.xlu1 %v586_v7  ;;  %942 = vmatprep.subr.bf16.mxu1 %v2824_v26  ;;  %v2853_v44 = vld [vmem:[%s3556_s12 + $0x164] ss:$24 sps:$4 sm:$0xff]   ;;  %v2850_v45 = vld [vmem:[%s3556_s12 + $0x8] ss:$24 sps:$4 sm:$0xff]   ;;  %s3166_s15 = scalar_lea.vmem %s2222_s24, 512  ;;  %p3173_p9 = scmp.lt.s32.totalorder %s2222_s24, %s2222_s24 }
  0xd3   : > { %v3633_v17 = vld [vmem:[%s3550_s21] sm:$0xff]  ;;  %p3167_p6 = scmp.ne.s32.totalorder %s2222_s24, %s3166_s15  ;;  %p3174_p11 = scmp.lt.s32.totalorder %s3166_s15, %s3166_s15 }
  0xd4   : > { %576 = vadd.xlane.f32.xlu0 %v3583_v8  ;;  %890 = vmatpush1.bf16.msra.mxu0 %v2823_v25 }
  0xd5   : > { %891 = vmatprep.subr.bf16.mxu0 %v2827_v28  ;;  %943 = vmatpush1.bf16.msra.mxu1 %v2826_v27  ;;  %p3168_p4 = pnand %p3167_p6, %p2756_p0  ;;  %p3175_p2 = por %p3174_p11, %p3173_p9 }
  0xd6   : > { %578 = vadd.xlane.f32.xlu1 %v3586_v9  ;;  %944 = vmatprep.subr.bf16.mxu1 %v2830_v29 }
  0xd7   : > { %p3169_p8 = pneg %p3168_p4 }
  0xd8   : > { %593 = vadd.xlane.f32.xlu0 %v587_v10  ;;  %892 = vmatpush1.bf16.msra.mxu0 %v2829_v30 }
  0xd9   : > { %893 = vmatprep.subr.bf16.mxu0 %v2833_v31  ;;  %945 = vmatpush1.bf16.msra.mxu1 %v2832_v32  ;;  %p3176_p3 = pnand %p3175_p2, %p3169_p8 }
  0xda   : > { %595 = vadd.xlane.f32.xlu1 %v588_v12  ;;  %946 = vmatprep.subr.bf16.mxu1 %v2836_v34  ;;  %v3629_v12 = vshrl.u32 %v625_v1, 7 }
  0xdc   : > { %894 = vmatpush1.bf16.msra.mxu0 %v2835_v33  ;;  %v627_v16 = vsub.s32 0, %v3629_v12  ;;  %v635_v22 = vsub.s32 1, %v3629_v12  ;;  %v2851_v33 = vld [vmem:[%s3556_s12 + $0x160] ss:$24 sps:$4 sm:$0xff]  }
  0xdd   : > { %895 = vmatprep.subr.bf16.mxu0 %v2839_v35  ;;  %947 = vmatpush1.bf16.msra.mxu1 %v2838_v36  ;;  %v2856_v35 = vld [vmem:[%s3556_s12 + $0x134] ss:$24 sps:$4 sm:$0xff]  }
  0xde   : > { %948 = vmatprep.subr.bf16.mxu1 %v2842_v38  ;;  %v628_v21 = vrot.slane %v3633_v17, %v627_v16  ;;  %v636_v27 = vrot.slane %v3633_v17, %v635_v22 }
  0xe0   : > { %896 = vmatpush1.bf16.msra.mxu0 %v2841_v37 }
  0xe1   : > { %897 = vmatprep.subr.bf16.mxu0 %v2845_v40  ;;  %949 = vmatpush1.bf16.msra.mxu1 %v2844_v39 }
  0xe2   : > { %950 = vmatprep.subr.bf16.mxu1 %v2848_v42 }
  0xe4   : > { %898 = vmatpush1.bf16.msra.mxu0 %v2847_v43  ;;  %v2857_v43 = vld [vmem:[%s3556_s12 + $0x100] ss:$24 sps:$4 sm:$0xff]  }
  0xe5   : > { %989 = vmatprep.subr.bf16.mxu0 %v2853_v44  ;;  %951 = vmatpush1.bf16.msra.mxu1 %v2850_v45  ;;  %v2862_v44 = vld [vmem:[%s3556_s12 + $0xd4] ss:$24 sps:$4 sm:$0xff]  }
 0x155   : > { %v573_v46 = vpop.xlane.xlu0 %572 }
 0x156   : > { %v581_v47 = vmul.f32 0.0078125, %v573_v46  ;;  %v2860_v46 = vld [vmem:[%s3556_s12 + $0xd0] ss:$24 sps:$4 sm:$0xff]  }
 0x157   : > { %v590_v48 = vpop.xlane.xlu1 %589 }
 0x158   : > { %v605_v49 = vmul.f32 %v581_v47, %v581_v47  ;;  %v597_v50 = vmul.f32 0.0078125, %v590_v48  ;;  %v601_v18 = vsub.f32 %v3574_v4, %v581_v47  ;;  %v2865_v47 = vld [vmem:[%s3556_s12 + $0xa4] ss:$24 sps:$4 sm:$0xff]   ;;  %v2863_v48 = vld [vmem:[%s3556_s12 + $0xa0] ss:$24 sps:$4 sm:$0xff]  }
 0x159   : > { %v575_v51 = vpop.xlane.xlu0 %574 }
 0x15a   : > { %v609_v52 = vsub.f32 %v597_v50, %v605_v49  ;;  %v582_v53 = vmul.f32 0.0078125, %v575_v51  ;;  %v2868_v49 = vld [vmem:[%s3556_s12 + $0x74] ss:$24 sps:$4 sm:$0xff]   ;;  %v2866_v50 = vld [vmem:[%s3556_s12 + $0x70] ss:$24 sps:$4 sm:$0xff]  }
 0x15b   : > { %v592_v54 = vpop.xlane.xlu1 %591  ;;  %v2871_v51 = vld [vmem:[%s3556_s12 + $0x44] ss:$24 sps:$4 sm:$0xff]  }
 0x15c   : > { %v613_v55 = vadd.f32 1e-05, %v609_v52  ;;  %v606_v56 = vmul.f32 %v582_v53, %v582_v53  ;;  %v598_v57 = vmul.f32 0.0078125, %v592_v54  ;;  %v602_v23 = vsub.f32 %v3576_v5, %v582_v53  ;;  %v2869_v52 = vld [vmem:[%s3556_s12 + $0x40] ss:$24 sps:$4 sm:$0xff]  }
 0x15d   : > { %v577_v58 = vpop.xlane.xlu0 %576  ;;  %v2874_v53 = vld [vmem:[%s3556_s12 + $0x14] ss:$24 sps:$4 sm:$0xff]   ;;  %v2872_v54 = vld [vmem:[%s3556_s12 + $0x10] ss:$24 sps:$4 sm:$0xff]  }
 0x15e   : > { %2931 = vrsqrt.f32 %v613_v55  ;;  %v610_v59 = vsub.f32 %v598_v57, %v606_v56  ;;  %v583_v60 = vmul.f32 0.0078125, %v577_v58  ;;  %v3255_v55 = vmov 0.0  }
 0x15f   : > { %v579_v61 = vpop.xlane.xlu1 %578  ;;  %2584 = vmatprep.subr.bf16.mxu1 %v3255_v55 }
 0x160   : > { %v614_v62 = vadd.f32 1e-05, %v610_v59  ;;  %v607_v63 = vmul.f32 %v583_v60, %v583_v60  ;;  %v584_v0 = vmul.f32 0.0078125, %v579_v61  ;;  %v603_v28 = vsub.f32 %v3583_v8, %v583_v60  ;;  %v2854_v8 = vld [vmem:[%s3556_s12 + $0x130] ss:$24 sps:$4 sm:$0xff]  }
 0x161   : > { %v594_v2 = vpop.xlane.xlu0 %593 }
 0x162   : > { %2933 = vrsqrt.f32 %v614_v62  ;;  %v608_v3 = vmul.f32 %v584_v0, %v584_v0  ;;  %v599_v6 = vmul.f32 0.0078125, %v594_v2  ;;  %v604_v29 = vsub.f32 %v3586_v9, %v584_v0  ;;  %v2859_v9 = vld [vmem:[%s3556_s12 + $0x104] ss:$24 sps:$4 sm:$0xff]  }
 0x163   : > { %v596_v7 = vpop.xlane.xlu1 %595 }
 0x164   : > { %v611_v10 = vsub.f32 %v599_v6, %v607_v63  ;;  %v600_v11 = vmul.f32 0.0078125, %v596_v7 }
 0x166   : > { %v615_v13 = vadd.f32 1e-05, %v611_v10  ;;  %v612_v14 = vsub.f32 %v600_v11, %v608_v3 }
 0x168   : > { %2935 = vrsqrt.f32 %v615_v13  ;;  %v616_v15 = vadd.f32 1e-05, %v612_v14 }
 0x16a   : > { %2937 = vrsqrt.f32 %v616_v15 }
 0x16b   : > { %v2932_v19 = vpop.eup %2931 }
 0x16c   : > { %v621_v20 = vmul.f32 %v2932_v19, %v601_v18 }
 0x16e   : > { %v629_v26 = vmul.f32 %v628_v21, %v621_v20 }
 0x16f   : > { %v2934_v24 = vpop.eup %2933 }
 0x170   : > { %v622_v25 = vmul.f32 %v2934_v24, %v602_v23  ;;  %v637_v30 = vadd.f32 %v636_v27, %v629_v26 }
 0x172   : > { %v630_v4 = vmul.f32 %v628_v21, %v622_v25 }
 0x174   : > { %v638_v31 = vadd.f32 %v636_v27, %v630_v4 }
 0x175   : > { %v2936_v32 = vpop.eup %2935 }
 0x176   : > { %v641_v34 = vpack.c.bf16 %v638_v31, %v637_v30  ;;  %v623_v36 = vmul.f32 %v2936_v32, %v603_v28 }
 0x177   : > { %v2938_v5 = vpop.eup %2937 }
 0x178   : > { %916 = vmatmul.mubr.bf16.vlgmr.msra.gmra.mxu0 %v641_v34  ;;  %969 = vmatmul.mubr.bf16.vlgmr.msra.gmra.mxu1 %v641_v34  ;;  %v624_v37 = vmul.f32 %v2938_v5, %v604_v29  ;;  %v631_v38 = vmul.f32 %v628_v21, %v623_v36 }
 0x179   : > { %990 = vmatpush1.bf16.msra.mxu0 %v2851_v33  ;;  %925 = vmatprep.mubr.bf16.mxu0 %v3254_v41 }
 0x17a   : > { %991 = vmatprep.subr.bf16.mxu0 %v2856_v35  ;;  %v632_v39 = vmul.f32 %v628_v21, %v624_v37  ;;  %v639_v40 = vadd.f32 %v636_v27, %v631_v38  ;;  %978 = vmatprep.mubr.bf16.mxu1 %v3254_v41 }
 0x17c   : > { %v640_v42 = vadd.f32 %v636_v27, %v632_v39 }
 0x17d   : > { %992 = vmatpush1.bf16.msra.mxu0 %v2854_v8 }
 0x17e   : > { %993 = vmatprep.subr.bf16.mxu0 %v2859_v9  ;;  %v642_v45 = vpack.c.bf16 %v640_v42, %v639_v40 }
 0x180   : > { %926 = vmatmul.mubr.bf16.gmra.mxu0 %v642_v45  ;;  %979 = vmatmul.mubr.bf16.gmra.mxu1 %v642_v45 }
 0x181   : > { %994 = vmatpush1.bf16.msra.mxu0 %v2857_v43  ;;  %1021 = vmatprep.mubr.bf16.mxu0 %v3254_v41 }
 0x182   : > { %995 = vmatprep.subr.bf16.mxu0 %v2862_v44  ;;  %2586 = vmatprep.mubr.msk.bf16.mxu1 %vm3256_vm0, %v3255_v55 }
 0x185   : > { %996 = vmatpush1.bf16.msra.mxu0 %v2860_v46 }
 0x186   : > { %997 = vmatprep.subr.bf16.mxu0 %v2865_v47 }
 0x189   : > { %998 = vmatpush1.bf16.msra.mxu0 %v2863_v48 }
 0x18a   : > { %999 = vmatprep.subr.bf16.mxu0 %v2868_v49 }
 0x18d   : > { %1000 = vmatpush1.bf16.msra.mxu0 %v2866_v50 }
 0x18e   : > { %1001 = vmatprep.subr.bf16.mxu0 %v2871_v51 }
 0x191   : > { %1002 = vmatpush1.bf16.msra.mxu0 %v2869_v52 }
 0x192   : > { %1003 = vmatprep.subr.bf16.mxu0 %v2874_v53 }
 0x195   : > { %1004 = vmatpush1.bf16.msra.mxu0 %v2872_v54 }
 0x196   : > { %2608 = vmatprep.subr.bf16.mxu0 %v3255_v55 }
 0x198   : > { %1022 = vmatmul.mubr.bf16.vlgmr.msra.gmra.mxu0 %v641_v34 }
 0x199   : > { %1031 = vmatprep.mubr.bf16.mxu0 %v3254_v41 }
 0x1a0   : > { %1032 = vmatmul.mubr.bf16.gmra.mxu0 %v642_v45 }
 0x1a1   : > { %2624 = vmatprep.mubr.msk.bf16.mxu0 %vm3256_vm0, %v3255_v55 }
 0x238   : > { %v917_v56 = vpop.f32.mrf.mxu0  ;;  %v970_v57 = vpop.f32.mrf.mxu1 }
 0x23a   : > { %v919_v58 = vpop.f32.mrf.mxu0  ;;  %v972_v59 = vpop.f32.mrf.mxu1 }
 0x23c   : > { %v921_v60 = vpop.f32.mrf.mxu0  ;;  %v974_v61 = vpop.f32.mrf.mxu1 }
 0x23d   : > { %v1044_v62 = vpack.c.bf16 %v974_v61, %v970_v57  ;;  %v1042_v11 = vpack.c.bf16 %v921_v60, %v917_v56 }
 0x23e   : > { %v923_v63 = vpop.f32.mrf.mxu0  ;;  %v976_v0 = vpop.f32.mrf.mxu1 }
 0x23f   : > { %v1043_v1 = vpack.c.bf16 %v923_v63, %v919_v58  ;;  %v1045_v2 = vpack.c.bf16 %v976_v0, %v972_v59  ;;  %2585 = vmatpush3.bf16.xpose.msra.mxu1 %v1044_v62  ;;  %v3710_v59 = vld [vmem:[%s3558_s16 + $0x38] sm:$0xff]   ;;  %v3717_v63 = vld [vmem:[%s3558_s16 + $0x30] sm:$0xff]  }
 0x240   : > { %v3667_v3 = vpop.f32.mrf.mxu0  ;;  %2590 = vmatprep.subr.bf16.mxu1 %v3255_v55  ;;  %v3670_v6 = vpop.f32.mrf.mxu1 }
 0x242   : > { %v3672_v7 = vpop.f32.mrf.mxu0  ;;  %v3674_v10 = vpop.f32.mrf.mxu1 }
 0x244   : > { %v3676_v13 = vpop.f32.mrf.mxu0  ;;  %v3678_v14 = vpop.f32.mrf.mxu1 }
 0x245   : > { %v1048_v15 = vpack.c.bf16 %v3676_v13, %v3667_v3  ;;  %v1050_v16 = vpack.c.bf16 %v3678_v14, %v3670_v6 }
 0x246   : > { %2587 = vmatmul.mubr.bf16.vlgmr.msra.gmra.mxu1 %v1042_v11  ;;  %v3684_v18 = vpop.f32.mrf.mxu0  ;;  %v3691_v24 = vpop.f32.mrf.mxu1  ;;  %v3735_v11 = vld [vmem:[%s3558_s16 + $0x18] sm:$0xff]  }
 0x247   : > { %v1049_v19 = vpack.c.bf16 %v3684_v18, %v3672_v7  ;;  %2592 = vmatprep.mubr.msk.bf16.mxu1 %vm3256_vm0, %v3255_v55 }
 0x258   : > { %v1023_v20 = vpop.f32.mrf.mxu0 }
 0x25a   : > { %v1025_v21 = vpop.f32.mrf.mxu0 }
 0x25c   : > { %v1027_v22 = vpop.f32.mrf.mxu0 }
 0x25d   : > { %v1046_v23 = vpack.c.bf16 %v1027_v22, %v1023_v20  ;;  %v3740_v20 = vld [vmem:[%s3558_s16 + $0x10] sm:$0xff]   ;;  %v3750_v22 = vld [vmem:[%s3558_s16] sm:$0xff]  }
 0x25e   : > { %v1029_v38 = vpop.f32.mrf.mxu0 }
 0x25f   : > { %2591 = vmatpush3.bf16.msra.mxu1 %v1046_v23  ;;  %v1047_v8 = vpack.c.bf16 %v1029_v38, %v1025_v21  ;;  %v3745_v21 = vld [vmem:[%s3558_s16 + $0x8] sm:$0xff]   ;;  %v2883_v23 = vld [vmem:[%s3558_s16 + $0x78] sm:$0xff]  }
 0x260   : > { %2596 = vmatprep.subr.bf16.mxu1 %v3255_v55  ;;  %2609 = vmatpush3.bf16.msra.mxu0 %v2883_v23 }
 0x261   : > { %2610 = vmatprep.subr.bf16.mxu0 %v3255_v55 }
 0x306   : > { %v1088_v25 = vpop.f32.mrf.mxu1 }
 0x307   : > { %v1096_v26 = vsel %vm1095_vm1, %v1088_v25, -inf }
 0x308   : > { %1097 = vmax.xlane.f32.xlu0 %v1096_v26  ;;  %v2588_v27 = vpop.f32.mrf.mxu1  ;;  %v2885_v26 = vld [vmem:[%s3558_s16 + $0x68] sm:$0xff]  }
 0x309   : > { %v2886_v27 = vld [vmem:[%s3558_s16 + $0x60] sm:$0xff]  }
 0x30a   : > { %v1091_v28 = vpop.f32.mrf.mxu1 }
 0x30b   : > { %v1099_v4 = vsel %vm1095_vm1, %v1091_v28, -inf }
 0x30c   : > { %1100 = vmax.xlane.f32.xlu1 %v1099_v4  ;;  %v2589_v29 = vpop.f32.mrf.mxu1  ;;  %v2888_v4 = vld [vmem:[%s3558_s16 + $0x50] sm:$0xff]  }
 0x30d   : > { %v2889_v29 = vld [vmem:[%s3558_s16 + $0x48] sm:$0xff]  }
 0x391   : > { %v1098_v30 = vpop.xlane.xlu0 %1097 }
 0x392   : > { %v1102_v31 = vsub.f32 %v1088_v25, %v1098_v30  ;;  %v2884_v25 = vld [vmem:[%s3558_s16 + $0x70] sm:$0xff]   ;;  %v2890_v30 = vld [vmem:[%s3558_s16 + $0x40] sm:$0xff]  }
 0x393   : > { %2611 = vmatpush3.bf16.msra.mxu0 %v2884_v25 }
 0x394   : > { %v1104_v32 = vmul.f32 1.442695, %v1102_v31  ;;  %2612 = vmatprep.subr.bf16.mxu0 %v3255_v55 }
 0x395   : > { %v1101_v33 = vpop.xlane.xlu1 %1100 }
 0x396   : > { %v1103_v34 = vsub.f32 %v1091_v28, %v1101_v33  ;;  %2939 = vpow2.f32 %v1104_v32  ;;  %v2887_v28 = vld [vmem:[%s3558_s16 + $0x58] sm:$0xff]  }
 0x397   : > { %2613 = vmatpush3.bf16.msra.mxu0 %v2885_v26 }
 0x398   : > { %v1106_v35 = vmul.f32 1.442695, %v1103_v34  ;;  %2614 = vmatprep.subr.bf16.mxu0 %v3255_v55 }
 0x39a   : > { %2941 = vpow2.f32 %v1106_v35 }
 0x39b   : > { %2615 = vmatpush3.bf16.msra.mxu0 %v2886_v27 }
 0x39c   : > { %2616 = vmatprep.subr.bf16.mxu0 %v3255_v55 }
 0x39f   : > { %2617 = vmatpush3.bf16.msra.mxu0 %v2887_v28 }
 0x3a0   : > { %2618 = vmatprep.subr.bf16.mxu0 %v3255_v55 }
 0x3a3   : > { %v2940_v36 = vpop.eup %2939  ;;  %2619 = vmatpush3.bf16.msra.mxu0 %v2888_v4 }
 0x3a4   : > { %v1153_v60 = vsel %vm1095_vm1, %v2940_v36, 0.0  ;;  %2620 = vmatprep.subr.bf16.mxu0 %v3255_v55 }
 0x3a7   : > { %v2942_v5 = vpop.eup %2941  ;;  %2621 = vmatpush3.bf16.msra.mxu0 %v2889_v29 }
 0x3a8   : > { %v1108_v37 = vpack.c.bf16 %v2942_v5, %v2940_v36  ;;  %v1156_v0 = vsel %vm1095_vm1, %v2942_v5, 0.0  ;;  %2622 = vmatprep.subr.bf16.mxu0 %v3255_v55 }
 0x3aa   : > { %2593 = vmatmul.mubr.msk.bf16.vlgmr.msra.gmra.mxu1 %vm1095_vm1, %v1108_v37 }
 0x3ab   : > { %2597 = vmatpush3.bf16.xpose.msra.mxu1 %v1045_v2  ;;  %2598 = vmatprep.mubr.msk.bf16.mxu1 %vm3256_vm0, %v3255_v55  ;;  %v3731_v2 = vld [vmem:[%s3558_s16 + $0x20] sm:$0xff]  }
 0x3ac   : > { %2602 = vmatprep.subr.bf16.mxu1 %v3255_v55  ;;  %2623 = vmatpush3.bf16.msra.mxu0 %v2890_v30 }
 0x3ad   : > { %2648 = vmatprep.subr.bf16.mxu0 %v3255_v55 }
 0x3b2   : > { %2599 = vmatmul.mubr.bf16.vlgmr.msra.gmra.mxu1 %v1043_v1  ;;  %v3725_v1 = vld [vmem:[%s3558_s16 + $0x28] sm:$0xff]  }
 0x3b3   : > { %2603 = vmatpush3.bf16.msra.mxu1 %v1047_v8  ;;  %2604 = vmatprep.mubr.msk.bf16.mxu1 %vm3256_vm0, %v3255_v55  ;;  %v1051_v8 = vpack.c.bf16 %v3691_v24, %v3674_v10 }
 0x3b4   : > { %2628 = vmatprep.subr.bf16.mxu1 %v3255_v55 }
 0x46a   : > { %v3702_v9 = vpop.f32.mrf.mxu1 }
 0x46c   : > { %v2594_v39 = vpop.f32.mrf.mxu1 }
 0x46e   : > { %v3704_v40 = vpop.f32.mrf.mxu1 }
 0x470   : > { %v2595_v42 = vpop.f32.mrf.mxu1 }
 0x471   : > { %v1033_v42 = vpop.f32.mrf.mxu0 }
 0x472   : > { %v1198_v43 = vpop.f32.mrf.mxu1 }
 0x473   : > { %v1205_v44 = vsel %vm1095_vm1, %v1198_v43, -inf }
 0x474   : > { %1206 = vmax.xlane.f32.xlu0 %v1205_v44  ;;  %v2600_v45 = vpop.f32.mrf.mxu1  ;;  %v3795_v44 = vpop.f32.mrf.mxu0 }
 0x476   : > { %v1201_v46 = vpop.f32.mrf.mxu1  ;;  %v1037_v45 = vpop.f32.mrf.mxu0 }
 0x477   : > { %v1208_v47 = vsel %vm1095_vm1, %v1201_v46, -inf }
 0x478   : > { %1209 = vmax.xlane.f32.xlu1 %v1208_v47  ;;  %v2601_v48 = vpop.f32.mrf.mxu1 }
 0x4fd   : > { %v1207_v49 = vpop.xlane.xlu0 %1206 }
 0x4fe   : > { %v1211_v50 = vsub.f32 %v1198_v43, %v1207_v49 }
 0x500   : > { %v1213_v51 = vmul.f32 1.442695, %v1211_v50 }
 0x501   : > { %v1210_v52 = vpop.xlane.xlu1 %1209 }
 0x502   : > { %2943 = vpow2.f32 %v1213_v51  ;;  %v1212_v53 = vsub.f32 %v1201_v46, %v1210_v52  ;;  %v1052_v46 = vpack.c.bf16 %v1037_v45, %v1033_v42  ;;  %v1039_v52 = vpop.f32.mrf.mxu0  ;;  %v2996_v45 = vld [vmem:[#allocation13 + $0x8] sm:$0xff] }
 0x504   : > { %v1215_v54 = vmul.f32 1.442695, %v1212_v53 }
 0x506   : > { %2945 = vpow2.f32 %v1215_v54 }
 0x50f   : > { %v2944_v56 = vpop.eup %2943 }
 0x510   : > { %v1262_v57 = vsel %vm1095_vm1, %v2944_v56, 0.0 }
 0x511   : > { %1263 = vadd.xlane.f32.xlu0 %v1262_v57 }
 0x513   : > { %v2946_v58 = vpop.eup %2945 }
 0x514   : > { %v1265_v61 = vsel %vm1095_vm1, %v2946_v58, 0.0  ;;  %v1217_v62 = vpack.c.bf16 %v2946_v58, %v2944_v56 }
 0x515   : > { %1154 = vadd.xlane.f32.xlu0 %v1153_v60  ;;  %1266 = vadd.xlane.f32.xlu1 %v1265_v61 }
 0x516   : > { %2605 = vmatmul.mubr.msk.bf16.vlgmr.msra.gmra.mxu1 %vm1095_vm1, %v1217_v62 }
 0x517   : > { %2629 = vmatpush3.bf16.msra.mxu1 %v3710_v59  ;;  %2644 = vmatprep.mubr.msk.bf16.mxu1 %vm3256_vm0, %v3255_v55 }
 0x518   : > { %2630 = vmatprep.subr.bf16.mxu1 %v3255_v55 }
 0x519   : > { %1157 = vadd.xlane.f32.xlu1 %v1156_v0 }
 0x51b   : > { %2631 = vmatpush3.bf16.msra.mxu1 %v3717_v63 }
 0x51c   : > { %2632 = vmatprep.subr.bf16.mxu1 %v3255_v55 }
 0x51f   : > { %2633 = vmatpush3.bf16.msra.mxu1 %v3725_v1 }
 0x520   : > { %2634 = vmatprep.subr.bf16.mxu1 %v3255_v55 }
 0x523   : > { %2635 = vmatpush3.bf16.msra.mxu1 %v3731_v2 }
 0x524   : > { %2636 = vmatprep.subr.bf16.mxu1 %v3255_v55 }
 0x527   : > { %2637 = vmatpush3.bf16.msra.mxu1 %v3735_v11 }
 0x528   : > { %2638 = vmatprep.subr.bf16.mxu1 %v3255_v55 }
 0x52b   : > { %2639 = vmatpush3.bf16.msra.mxu1 %v3740_v20 }
 0x52c   : > { %2640 = vmatprep.subr.bf16.mxu1 %v3255_v55 }
 0x52f   : > { %2641 = vmatpush3.bf16.msra.mxu1 %v3745_v21 }
 0x530   : > { %2642 = vmatprep.subr.bf16.mxu1 %v3255_v55 }
 0x533   : > { %2643 = vmatpush3.bf16.msra.mxu1 %v3750_v22 }
 0x534   : > { %2660 = vmatprep.subr.bf16.mxu1 %v3255_v55 }
 0x59a   : > { %v1264_v31 = vpop.xlane.xlu0 %1263 }
 0x59e   : > { %v1155_v32 = vpop.xlane.xlu0 %1154  ;;  %v1267_v33 = vpop.xlane.xlu1 %1266 }
 0x59f   : > { %2947 = vrcp.f32 %v1155_v32 }
 0x5a2   : > { %v1158_v34 = vpop.xlane.xlu1 %1157 }
 0x5a3   : > { %2949 = vrcp.f32 %v1158_v34 }
 0x5a4   : > { %2951 = vrcp.f32 %v1264_v31 }
 0x5a5   : > { %2953 = vrcp.f32 %v1267_v33 }
 0x5ac   : > { %v2948_v35 = vpop.eup %2947 }
 0x5ad   : > { %v1161_v5 = vmul.f32 %v2948_v35, %v3702_v9 }
 0x5b0   : > { %v2950_v36 = vpop.eup %2949 }
 0x5b1   : > { %v1162_v37 = vmul.f32 %v2950_v36, %v3704_v40  ;;  %v2952_v18 = vpop.eup %2951 }
 0x5b3   : > { %v1163_v38 = vpack.c.bf16 %v1162_v37, %v1161_v5  ;;  %v1455_v37 = vsub.s32 2, %v3629_v12 }
 0x5b5   : > { %2645 = vmatmul.mubr.bf16.vlgmr.msra.gmra.mxu1 %v1163_v38 }
 0x5b6   : > { %2661 = vmatpush3.bf16.xpose.msra.mxu1 %v1051_v8  ;;  %2662 = vmatprep.mubr.msk.bf16.mxu1 %vm3256_vm0, %v3255_v55 }
 0x5b7   : > { %2672 = vmatprep.subr.bf16.mxu1 %v3255_v55 }
 0x5bd   : > { %2663 = vmatmul.mubr.bf16.vlgmr.msra.gmra.mxu1 %v1049_v19  ;;  %v2954_v19 = vpop.eup %2953 }
 0x5be   : > { %2673 = vmatpush3.bf16.msra.mxu1 %v2883_v23  ;;  %2688 = vmatprep.mubr.msk.bf16.mxu1 %vm3256_vm0, %v3255_v55 }
 0x5bf   : > { %2674 = vmatprep.subr.bf16.mxu1 %v3255_v55 }
 0x5c2   : > { %2675 = vmatpush3.bf16.msra.mxu1 %v2884_v25 }
 0x5c3   : > { %2676 = vmatprep.subr.bf16.mxu1 %v3255_v55 }
 0x5c6   : > { %2677 = vmatpush3.bf16.msra.mxu1 %v2885_v26 }
 0x5c7   : > { %2678 = vmatprep.subr.bf16.mxu1 %v3255_v55 }
 0x5ca   : > { %2679 = vmatpush3.bf16.msra.mxu1 %v2886_v27 }
 0x5cb   : > { %2680 = vmatprep.subr.bf16.mxu1 %v3255_v55 }
 0x5ce   : > { %2681 = vmatpush3.bf16.msra.mxu1 %v2887_v28 }
 0x5cf   : > { %2682 = vmatprep.subr.bf16.mxu1 %v3255_v55 }
 0x5d2   : > { %2683 = vmatpush3.bf16.msra.mxu1 %v2888_v4 }
 0x5d3   : > { %2684 = vmatprep.subr.bf16.mxu1 %v3255_v55 }
 0x5d6   : > { %v1255_v7 = vpop.f32.mrf.mxu1  ;;  %2685 = vmatpush3.bf16.msra.mxu1 %v2889_v29 }
 0x5d7   : > { %2686 = vmatprep.subr.bf16.mxu1 %v3255_v55  ;;  %v1270_v9 = vmul.f32 %v2952_v18, %v1255_v7  ;;  %v2995_v7 = vld [vmem:[#allocation13] sm:$0xff]  ;;  %v3811_v18 = vrot.slane %v3633_v17, %v1455_v37  ;;  %v2897_v37 = vld [vmem:[%s3564_s10 + $0x50] ss:$8 sps:$4 sm:$0xff]  }
 0x5d8   : > { %v2606_v10 = vpop.f32.mrf.mxu1 }
 0x5da   : > { %v1258_v24 = vpop.f32.mrf.mxu1  ;;  %2687 = vmatpush3.bf16.msra.mxu1 %v2890_v30 }
 0x5db   : > { %v1271_v39 = vmul.f32 %v2954_v19, %v1258_v24 }
 0x5dc   : > { %v2607_v40 = vpop.f32.mrf.mxu1 }
 0x5dd   : > { %v1272_v43 = vpack.c.bf16 %v1271_v39, %v1270_v9  ;;  %v1053_v40 = vpack.c.bf16 %v1039_v52, %v3795_v44 }
 0x5df   : > { %2625 = vmatmul.mubr.bf16.vlgmr.msra.gmra.mxu0 %v1272_v43 }
 0x5e0   : > { %2649 = vmatpush3.bf16.xpose.msra.mxu0 %v1050_v16  ;;  %2650 = vmatprep.mubr.msk.bf16.mxu0 %vm3256_vm0, %v3255_v55 }
 0x5e1   : > { %2654 = vmatprep.subr.bf16.mxu0 %v3255_v55 }
 0x5e7   : > { %2651 = vmatmul.mubr.bf16.vlgmr.msra.gmra.mxu0 %v1048_v15 }
 0x5e8   : > { %2655 = vmatpush3.bf16.msra.mxu0 %v1052_v46  ;;  %2656 = vmatprep.mubr.msk.bf16.mxu0 %vm3256_vm0, %v3255_v55 }
 0x5e9   : > { %2666 = vmatprep.subr.bf16.mxu0 %v3255_v55 }
 0x675   : > { %v1444_v6 = vpop.f32.mrf.mxu1 }
 0x677   : > { %v2646_v14 = vpop.f32.mrf.mxu1 }
 0x679   : > { %v1447_v16 = vpop.f32.mrf.mxu1 }
 0x67b   : > { %v2647_v47 = vpop.f32.mrf.mxu1 }
 0x67d   : > { %v1604_v48 = vpop.f32.mrf.mxu1 }
 0x67e   : > { %v1611_v62 = vsel %vm1095_vm1, %v1604_v48, -inf }
 0x67f   : > { %v2664_v49 = vpop.f32.mrf.mxu1 }
 0x681   : > { %v1607_v50 = vpop.f32.mrf.mxu1 }
 0x682   : > { %v1614_v25 = vsel %vm1095_vm1, %v1607_v50, -inf }
 0x683   : > { %v2665_v51 = vpop.f32.mrf.mxu1 }
 0x69f   : > { %v1355_v53 = vpop.f32.mrf.mxu0 }
 0x6a0   : > { %v1445_v54 = vadd.f32 %v1444_v6, %v1355_v53 }
 0x6a1   : > { %v2626_v56 = vpop.f32.mrf.mxu0 }
 0x6a2   : > { %v1451_v10 = vadd.f32 %v2995_v7, %v1445_v54  ;;  %v2905_v7 = vld [vmem:[%s3564_s10 + $0x34] ss:$8 sps:$4 sm:$0xff]  }
 0x6a3   : > { %v1358_v3 = vpop.f32.mrf.mxu0 }
 0x6a4   : > { %v1448_v13 = vadd.f32 %v1447_v16, %v1358_v3  ;;  %v3817_v43 = vadd.f32 %v3811_v18, %v1451_v10  ;;  %v2903_v10 = vld [vmem:[%s3564_s10 + $0x30] ss:$8 sps:$4 sm:$0xff]  }
 0x6a5   : > { %v2627_v15 = vpop.f32.mrf.mxu0 }
 0x6a6   : > { %v1452_v46 = vadd.f32 %v2996_v45, %v1448_v13  ;;  %v1783_v44 = vmul.f32 %v3817_v43, %v3817_v43 }
 0x6a7   : > { %v1495_v57 = vpop.f32.mrf.mxu0 }
 0x6a8   : > { %v1502_v58 = vsel %vm1095_vm1, %v1495_v57, -inf  ;;  %v3828_v14 = vadd.f32 %v3811_v18, %v1452_v46  ;;  %v2911_v46 = vld [vmem:[%s3564_s10 + $0x14] ss:$8 sps:$4 sm:$0xff]  }
 0x6a9   : > { %1503 = vmax.xlane.f32.xlu0 %v1502_v58  ;;  %v2652_v60 = vpop.f32.mrf.mxu0 }
 0x6aa   : > { %v1784_v47 = vmul.f32 %v3828_v14, %v3828_v14 }
 0x6ab   : > { %v1498_v61 = vpop.f32.mrf.mxu0 }
 0x6ac   : > { %v1505_v0 = vsel %vm1095_vm1, %v1498_v61, -inf }
 0x6ad   : > { %1612 = vmax.xlane.f32.xlu0 %v1611_v62  ;;  %1506 = vmax.xlane.f32.xlu1 %v1505_v0  ;;  %v2653_v23 = vpop.f32.mrf.mxu0 }
 0x6b1   : > { %1615 = vmax.xlane.f32.xlu1 %v1614_v25 }
 0x732   : > { %v1504_v26 = vpop.xlane.xlu0 %1503 }
 0x733   : > { %v1508_v27 = vsub.f32 %v1495_v57, %v1504_v26 }
 0x735   : > { %v1510_v28 = vmul.f32 1.442695, %v1508_v27 }
 0x736   : > { %v1613_v4 = vpop.xlane.xlu0 %1612  ;;  %v1507_v29 = vpop.xlane.xlu1 %1506 }
 0x737   : > { %2955 = vpow2.f32 %v1510_v28  ;;  %v1617_v30 = vsub.f32 %v1604_v48, %v1613_v4  ;;  %v1509_v31 = vsub.f32 %v1498_v61, %v1507_v29 }
 0x739   : > { %v1619_v32 = vmul.f32 1.442695, %v1617_v30  ;;  %v1512_v33 = vmul.f32 1.442695, %v1509_v31  ;;  %v2891_v31 = vld [vmem:[%s3564_s10 + $0x70] ss:$8 sps:$4 sm:$0xff]  }
 0x73a   : > { %v1616_v34 = vpop.xlane.xlu1 %1615 }
 0x73b   : > { %2957 = vpow2.f32 %v1619_v32  ;;  %v1618_v35 = vsub.f32 %v1607_v50, %v1616_v34  ;;  %v2896_v34 = vld [vmem:[%s3564_s10 + $0x64] ss:$8 sps:$4 sm:$0xff]  }
 0x73c   : > { %2959 = vpow2.f32 %v1512_v33 }
 0x73d   : > { %v1621_v36 = vmul.f32 1.442695, %v1618_v35 }
 0x73f   : > { %2961 = vpow2.f32 %v1621_v36  ;;  %v2894_v36 = vld [vmem:[%s3564_s10 + $0x60] ss:$8 sps:$4 sm:$0xff]  }
 0x744   : > { %v2956_v5 = vpop.eup %2955 }
 0x745   : > { %v1559_v38 = vsel %vm1095_vm1, %v2956_v5, 0.0 }
 0x746   : > { %1560 = vadd.xlane.f32.xlu0 %v1559_v38  ;;  %v2902_v38 = vld [vmem:[%s3564_s10 + $0x44] ss:$8 sps:$4 sm:$0xff]  }
 0x748   : > { %v2958_v8 = vpop.eup %2957 }
 0x749   : > { %v2960_v19 = vpop.eup %2959  ;;  %v1668_v24 = vsel %vm1095_vm1, %v2958_v8, 0.0 }
 0x74a   : > { %1669 = vadd.xlane.f32.xlu0 %v1668_v24  ;;  %v1562_v9 = vsel %vm1095_vm1, %v2960_v19, 0.0  ;;  %v1514_v39 = vpack.c.bf16 %v2960_v19, %v2956_v5  ;;  %v2899_v5 = vld [vmem:[%s3564_s10 + $0x54] ss:$8 sps:$4 sm:$0xff]   ;;  %v2908_v19 = vld [vmem:[%s3564_s10 + $0x24] ss:$8 sps:$4 sm:$0xff]  }
 0x74b   : > { %1563 = vadd.xlane.f32.xlu1 %v1562_v9 }
 0x74c   : > { %v2962_v42 = vpop.eup %2961  ;;  %2657 = vmatmul.mubr.msk.bf16.vlgmr.msra.gmra.mxu0 %vm1095_vm1, %v1514_v39  ;;  %v1825_v39 = vsub.s32 3, %v3629_v12 }
 0x74d   : > { %2667 = vmatpush3.bf16.msra.mxu0 %v1053_v40  ;;  %v1671_v6 = vsel %vm1095_vm1, %v2962_v42, 0.0  ;;  %2668 = vmatprep.mubr.msk.bf16.mxu0 %vm3256_vm0, %v3255_v55  ;;  %v1623_v16 = vpack.c.bf16 %v2962_v42, %v2958_v8  ;;  %v2900_v8 = vld [vmem:[%s3564_s10 + $0x40] ss:$8 sps:$4 sm:$0xff]  }
 0x74e   : > { %1771 = vadd.xlane.f32.xlu0 %v3817_v43  ;;  %2692 = vmatprep.subr.bf16.mxu0 %v3255_v55  ;;  %v2906_v42 = vld [vmem:[%s3564_s10 + $0x20] ss:$8 sps:$4 sm:$0xff]  }
 0x74f   : > { %1672 = vadd.xlane.f32.xlu1 %v1671_v6 }
 0x752   : > { %1787 = vadd.xlane.f32.xlu0 %v1783_v44 }
 0x753   : > { %1773 = vadd.xlane.f32.xlu1 %v3828_v14 }
 0x754   : > { %2669 = vmatmul.mubr.msk.bf16.vlgmr.msra.gmra.mxu0 %vm1095_vm1, %v1623_v16  ;;  %v3869_v16 = vrot.slane %v3633_v17, %v1825_v39 }
 0x755   : > { %2693 = vmatpush3.bf16.msra.mxu0 %v3710_v59  ;;  %2708 = vmatprep.mubr.msk.bf16.mxu0 %vm3256_vm0, %v3255_v55  ;;  %v2893_v59 = vld [vmem:[%s3564_s10 + $0x74] ss:$8 sps:$4 sm:$0xff]  }
 0x756   : > { %2694 = vmatprep.subr.bf16.mxu0 %v3255_v55  ;;  %1929 = vmatprep.subr.bf16.mxu1 %v2893_v59  ;;  %v2909_v59 = vld [vmem:[%s3564_s10 + $0x10] ss:$8 sps:$4 sm:$0xff]  }
 0x757   : > { %1789 = vadd.xlane.f32.xlu1 %v1784_v47  ;;  %v1833_v47 = vsub.s32 4, %v3629_v12 }
 0x759   : > { %2695 = vmatpush3.bf16.msra.mxu0 %v3717_v63 }
 0x75a   : > { %2696 = vmatprep.subr.bf16.mxu0 %v3255_v55 }
 0x75d   : > { %2697 = vmatpush3.bf16.msra.mxu0 %v3725_v1 }
 0x75e   : > { %2698 = vmatprep.subr.bf16.mxu0 %v3255_v55 }
 0x761   : > { %2699 = vmatpush3.bf16.msra.mxu0 %v3731_v2 }
 0x762   : > { %2700 = vmatprep.subr.bf16.mxu0 %v3255_v55 }
 0x765   : > { %2701 = vmatpush3.bf16.msra.mxu0 %v3735_v11 }
 0x766   : > { %2702 = vmatprep.subr.bf16.mxu0 %v3255_v55 }
 0x769   : > { %2703 = vmatpush3.bf16.msra.mxu0 %v3740_v20 }
 0x76a   : > { %2704 = vmatprep.subr.bf16.mxu0 %v3255_v55 }
 0x76d   : > { %2705 = vmatpush3.bf16.msra.mxu0 %v3745_v21 }
 0x76e   : > { %2706 = vmatprep.subr.bf16.mxu0 %v3255_v55 }
 0x771   : > { %2707 = vmatpush3.bf16.msra.mxu0 %v3750_v22 }
 0x7cf   : > { %v1561_v1 = vpop.xlane.xlu0 %1560 }
 0x7d0   : > { %2963 = vrcp.f32 %v1561_v1 }
 0x7d3   : > { %v1670_v11 = vpop.xlane.xlu0 %1669 }
 0x7d4   : > { %v1564_v63 = vpop.xlane.xlu1 %1563 }
 0x7d5   : > { %2965 = vrcp.f32 %v1564_v63  ;;  %v2914_v63 = vld [vmem:[%s3564_s10 + $0x4] ss:$8 sps:$4 sm:$0xff]  }
 0x7d6   : > { %2967 = vrcp.f32 %v1670_v11  ;;  %v3877_v11 = vrot.slane %v3633_v17, %v1833_v47  ;;  %v2916_v17 = vld [vmem:[%s3566_s11 + $0x38] sm:$0xff]  }
 0x7d7   : > { %v1772_v20 = vpop.xlane.xlu0 %1771 }
 0x7d8   : > { %v1673_v2 = vpop.xlane.xlu1 %1672  ;;  %v1779_v13 = vmul.f32 0.0078125, %v1772_v20 }
 0x7d9   : > { %2969 = vrcp.f32 %v1673_v2 }
 0x7da   : > { %v1803_v23 = vmul.f32 %v1779_v13, %v1779_v13  ;;  %v1799_v45 = vsub.f32 %v3817_v43, %v1779_v13  ;;  %v2926_v13 = vld [vmem:[%s3566_s11 + $0x10] sm:$0xff]  }
 0x7db   : > { %v1788_v56 = vpop.xlane.xlu0 %1787 }
 0x7dc   : > { %v1774_v48 = vpop.xlane.xlu1 %1773  ;;  %v1795_v60 = vmul.f32 0.0078125, %v1788_v56  ;;  %v2924_v56 = vld [vmem:[%s3566_s11 + $0x18] sm:$0xff]  }
 0x7dd   : > { %v2964_v51 = vpop.eup %2963  ;;  %v1780_v53 = vmul.f32 0.0078125, %v1774_v48  ;;  %v2912_v48 = vld [vmem:[%s3564_s10] ss:$8 sps:$4 sm:$0xff]  }
 0x7de   : > { %v1807_v28 = vsub.f32 %v1795_v60, %v1803_v23  ;;  %v2930_v60 = vld [vmem:[%s3566_s11] sm:$0xff]  }
 0x7df   : > { %v1804_v61 = vmul.f32 %v1780_v53, %v1780_v53  ;;  %v1800_v9 = vsub.f32 %v3828_v14, %v1780_v53  ;;  %v2920_v53 = vld [vmem:[%s3566_s11 + $0x28] sm:$0xff]  }
 0x7e0   : > { %v1790_v52 = vpop.xlane.xlu1 %1789  ;;  %v1811_v35 = vadd.f32 1e-05, %v1807_v28  ;;  %v2997_v28 = vld [vmem:[#allocation13 + $0x10] sm:$0xff] }
 0x7e1   : > { %v1796_v15 = vmul.f32 0.0078125, %v1790_v52  ;;  %v2918_v52 = vld [vmem:[%s3566_s11 + $0x30] sm:$0xff]  }
 0x7e2   : > { %v2966_v21 = vpop.eup %2965 }
 0x7e3   : > { %v2968_v0 = vpop.eup %2967  ;;  %v1808_v25 = vsub.f32 %v1796_v15, %v1804_v61  ;;  %v2927_v15 = vld [vmem:[%s3566_s11 + $0x48] sm:$0xff]  }
 0x7e5   : > { %v1812_v32 = vadd.f32 1e-05, %v1808_v25 }
 0x7e6   : > { %v2970_v26 = vpop.eup %2969 }
 0x7e7   : > { %2971 = vrsqrt.f32 %v1812_v32 }
 0x7e8   : > { %2973 = vrsqrt.f32 %v1811_v35 }
 0x7f4   : > { %v2972_v24 = vpop.eup %2971 }
 0x7f5   : > { %v2974_v40 = vpop.eup %2973  ;;  %v1820_v6 = vmul.f32 %v2972_v24, %v1800_v9 }
 0x7f6   : > { %v1819_v44 = vmul.f32 %v2974_v40, %v1799_v45 }
 0x7f7   : > { %v1828_v1 = vmul.f32 %v3869_v16, %v1820_v6 }
 0x7f8   : > { %v1827_v2 = vmul.f32 %v3869_v16, %v1819_v44 }
 0x7f9   : > { %v1836_v20 = vadd.f32 %v3877_v11, %v1828_v1 }
 0x80c   : > { %v1552_v49 = vpop.f32.mrf.mxu0 }
 0x80d   : > { %v1567_v22 = vmul.f32 %v2964_v51, %v1552_v49  ;;  %v1835_v49 = vadd.f32 %v3877_v11, %v1827_v2  ;;  %v2915_v51 = vld [vmem:[%s3566_s11 + $0x78] sm:$0xff]  }
 0x80e   : > { %v2658_v50 = vpop.f32.mrf.mxu0  ;;  %2556 = vmatprep.subr.bf16.mxu0 %v2915_v51 }
 0x80f   : > { %v1839_v50 = vpack.c.bf16 %v1836_v20, %v1835_v49 }
 0x810   : > { %v1555_v55 = vpop.f32.mrf.mxu0 }
 0x811   : > { %v1568_v54 = vmul.f32 %v2966_v21, %v1555_v55  ;;  %v2917_v21 = vld [vmem:[%s3566_s11 + $0x70] sm:$0xff]   ;;  %v2919_v55 = vld [vmem:[%s3566_s11 + $0x68] sm:$0xff]  }
 0x812   : > { %v2659_v3 = vpop.f32.mrf.mxu0 }
 0x813   : > { %v1569_v57 = vpack.c.bf16 %v1568_v54, %v1567_v22  ;;  %v2921_v22 = vld [vmem:[%s3566_s11 + $0x60] sm:$0xff]   ;;  %v2923_v54 = vld [vmem:[%s3566_s11 + $0x58] sm:$0xff]   ;;  %v2925_v3 = vld [vmem:[%s3566_s11 + $0x50] sm:$0xff]  }
 0x814   : > { %v1661_v58 = vpop.f32.mrf.mxu0 }
 0x815   : > { %2709 = vmatmul.mubr.bf16.vlgmr.msra.gmra.mxu0 %v1569_v57  ;;  %v1676_v4 = vmul.f32 %v2968_v0, %v1661_v58  ;;  %v2928_v57 = vld [vmem:[%s3566_s11 + $0x8] sm:$0xff]   ;;  %v2929_v58 = vld [vmem:[%s3566_s11 + $0x40] sm:$0xff]  }
 0x816   : > { %v2670_v62 = vpop.f32.mrf.mxu0  ;;  %2557 = vmatpush3.bf16.msra.mxu0 %v2916_v17 }
 0x817   : > { %2558 = vmatprep.subr.bf16.mxu0 %v2917_v21 }
 0x818   : > { %v1664_v27 = vpop.f32.mrf.mxu0 }
 0x819   : > { %v1677_v29 = vmul.f32 %v2970_v26, %v1664_v27 }
 0x81a   : > { %v2671_v30 = vpop.f32.mrf.mxu0  ;;  %2559 = vmatpush3.bf16.msra.mxu0 %v2918_v52 }
 0x81b   : > { %v1678_v33 = vpack.c.bf16 %v1677_v29, %v1676_v4  ;;  %2560 = vmatprep.subr.bf16.mxu0 %v2919_v55 }
 0x81d   : > { %2689 = vmatmul.mubr.bf16.vlgmr.msra.gmra.mxu1 %v1678_v33  ;;  %v2998_v33 = vld [vmem:[#allocation13 + $0x18] sm:$0xff] }
 0x81e   : > { %1930 = vmatpush1.bf16.msra.mxu1 %v2891_v31  ;;  %1961 = vmatprep.mubr.bf16.mxu1 %v3254_v41 }
 0x81f   : > { %1931 = vmatprep.subr.bf16.mxu1 %v2896_v34  ;;  %2561 = vmatpush3.bf16.msra.mxu0 %v2920_v53 }
 0x820   : > { %2562 = vmatprep.subr.bf16.mxu0 %v2921_v22 }
 0x822   : > { %1932 = vmatpush1.bf16.msra.mxu1 %v2894_v36 }
 0x823   : > { %1933 = vmatprep.subr.bf16.mxu1 %v2899_v5 }
 0x826   : > { %1934 = vmatpush1.bf16.msra.mxu1 %v2897_v37  ;;  %v1843_v37 = vsub.s32 5, %v3629_v12 }
 0x827   : > { %1935 = vmatprep.subr.bf16.mxu1 %v2902_v38  ;;  %v439_v38 = vld [vmem:[%s3550_s21 + $0x8] sm:$0xff] }
 0x82a   : > { %1936 = vmatpush1.bf16.msra.mxu1 %v2900_v8  ;;  %v3914_v8 = vld [vmem:[%s3550_s21] sm:$0xff] }
 0x82b   : > { %1937 = vmatprep.subr.bf16.mxu1 %v2905_v7  ;;  %v3917_v7 = vrot.slane %v3914_v8, %v1843_v37 }
 0x82e   : > { %1938 = vmatpush1.bf16.msra.mxu1 %v2903_v10 }
 0x82f   : > { %1939 = vmatprep.subr.bf16.mxu1 %v2908_v19 }
 0x832   : > { %1940 = vmatpush1.bf16.msra.mxu1 %v2906_v42 }
 0x833   : > { %1941 = vmatprep.subr.bf16.mxu1 %v2911_v46 }
 0x836   : > { %1942 = vmatpush1.bf16.msra.mxu1 %v2909_v59 }
 0x837   : > { %1943 = vmatprep.subr.bf16.mxu1 %v2914_v63 }
 0x83a   : > { %1944 = vmatpush1.bf16.msra.mxu1 %v2912_v48 }
 0x83d   : > { %1962 = vmatmul.mubr.bf16.vlgmr.msra.gmra.mxu1 %v1839_v50 }
 0x83e   : > { %1971 = vmatprep.mubr.bf16.mxu1 %v3254_v41  ;;  %v2922_v41 = vld [vmem:[%s3566_s11 + $0x20] sm:$0xff]  }
 0x83f   : > { %2563 = vmatpush3.bf16.msra.mxu0 %v2922_v41 }
 0x840   : > { %2564 = vmatprep.subr.bf16.mxu0 %v2923_v54 }
 0x843   : > { %2565 = vmatpush3.bf16.msra.mxu0 %v2924_v56 }
 0x844   : > { %2566 = vmatprep.subr.bf16.mxu0 %v2925_v3 }
 0x847   : > { %2567 = vmatpush3.bf16.msra.mxu0 %v2926_v13 }
 0x848   : > { %2568 = vmatprep.subr.bf16.mxu0 %v2927_v15 }
 0x84b   : > { %2569 = vmatpush3.bf16.msra.mxu0 %v2928_v57 }
 0x84c   : > { %2570 = vmatprep.subr.bf16.mxu0 %v2929_v58 }
 0x84f   : > { %2571 = vmatpush3.bf16.msra.mxu0 %v2930_v60 }
 0x8d5   : > { %v1754_v61 = vpop.f32.mrf.mxu0 }
 0x8d7   : > { %v2710_v62 = vpop.f32.mrf.mxu0 }
 0x8d9   : > { %v1757_v0 = vpop.f32.mrf.mxu0 }
 0x8db   : > { %v2711_v23 = vpop.f32.mrf.mxu0 }
 0x8dd   : > { %v1713_v25 = vpop.f32.mrf.mxu1 }
 0x8de   : > { %v1755_v26 = vadd.f32 %v1754_v61, %v1713_v25 }
 0x8df   : > { %v2690_v27 = vpop.f32.mrf.mxu1 }
 0x8e0   : > { %v1761_v4 = vadd.f32 %v2997_v28, %v1755_v26 }
 0x8e1   : > { %v1716_v29 = vpop.f32.mrf.mxu1 }
 0x8e2   : > { %v3900_v30 = vadd.f32 %v1761_v4, %v3811_v18  ;;  %v1758_v31 = vadd.f32 %v1757_v0, %v1716_v29 }
 0x8e3   : > { %v2691_v32 = vpop.f32.mrf.mxu1 }
 0x8e4   : > { %v1762_v34 = vadd.f32 %v2998_v33, %v1758_v31  ;;  %1775 = vadd.xlane.f32.xlu0 %v3900_v30  ;;  %v1785_v36 = vmul.f32 %v3900_v30, %v3900_v30 }
 0x8e6   : > { %v3904_v35 = vadd.f32 %v1762_v34, %v3811_v18  ;;  %v3919_v18 = vrot.slane %v439_v38, %v1843_v37 }
 0x8e8   : > { %1791 = vadd.xlane.f32.xlu0 %v1785_v36  ;;  %1777 = vadd.xlane.f32.xlu1 %v3904_v35  ;;  %v1786_v5 = vmul.f32 %v3904_v35, %v3904_v35 }
 0x8ec   : > { %1793 = vadd.xlane.f32.xlu1 %v1786_v5 }
 0x8fd   : > { %v1963_v10 = vpop.f32.mrf.mxu1 }
 0x8fe   : > { %v1964_v19 = vadd.f32 %v1963_v10, %v3917_v7 }
 0x8ff   : > { %v1965_v24 = vpop.f32.mrf.mxu1 }
 0x900   : > { %v1990_v9 = vmul.f32 0.044715, %v1964_v19  ;;  %v1966_v39 = vadd.f32 %v1965_v24, %v3919_v18  ;;  %v1982_v23 = vmul.f32 0.5, %v1964_v19 }
 0x901   : > { %v1967_v40 = vpop.f32.mrf.mxu1 }
 0x902   : > { %v1998_v42 = vmul.f32 %v1990_v9, %v1964_v19  ;;  %v1991_v45 = vmul.f32 0.044715, %v1966_v39  ;;  %v1968_v46 = vadd.f32 %v1967_v40, %v3917_v7  ;;  %v1983_v61 = vmul.f32 0.5, %v1966_v39 }
 0x903   : > { %v1969_v6 = vpop.f32.mrf.mxu1 }
 0x904   : > { %v2006_v44 = vmul.f32 %v1998_v42, %v1964_v19  ;;  %v1999_v47 = vmul.f32 %v1991_v45, %v1966_v39  ;;  %v1992_v59 = vmul.f32 0.044715, %v1968_v46  ;;  %v1970_v63 = vadd.f32 %v1969_v6, %v3919_v18 }
 0x905   : > { %v1984_v58 = vmul.f32 0.5, %v1968_v46 }
 0x906   : > { %v2014_v1 = vadd.f32 %v2006_v44, %v1964_v19  ;;  %v2007_v2 = vmul.f32 %v1999_v47, %v1966_v39  ;;  %v2000_v48 = vmul.f32 %v1992_v59, %v1968_v46  ;;  %v1993_v20 = vmul.f32 0.044715, %v1970_v63 }
 0x907   : > { %v1985_v62 = vmul.f32 0.5, %v1970_v63 }
 0x908   : > { %v2008_v49 = vmul.f32 %v2000_v48, %v1968_v46  ;;  %v2001_v50 = vmul.f32 %v1993_v20, %v1970_v63  ;;  %v2015_v51 = vadd.f32 %v2007_v2, %v1966_v39  ;;  %v2022_v17 = vmul.f32 0.7978846, %v2014_v1 }
 0x909   : > { %v2060_v20 = vsub.s32 6, %v3629_v12 }
 0x90a   : > { %v2016_v21 = vadd.f32 %v2008_v49, %v1968_v46  ;;  %v2009_v52 = vmul.f32 %v2001_v50, %v1970_v63  ;;  %v2023_v55 = vmul.f32 0.7978846, %v2015_v51 }
 0x90b   : > { %v3933_v50 = vrot.slane %v3914_v8, %v2060_v20 }
 0x90c   : > { %v2024_v53 = vmul.f32 0.7978846, %v2016_v21  ;;  %v2017_v22 = vadd.f32 %v2009_v52, %v1970_v63  ;;  %2975 = vtanh.f32 %v2023_v55 }
 0x90d   : > { %2977 = vtanh.f32 %v2022_v17 }
 0x90e   : > { %2979 = vtanh.f32 %v2024_v53  ;;  %v2025_v41 = vmul.f32 0.7978846, %v2017_v22 }
 0x910   : > { %2981 = vtanh.f32 %v2025_v41 }
 0x919   : > { %v2976_v54 = vpop.eup %2975 }
 0x91a   : > { %v2978_v56 = vpop.eup %2977  ;;  %v2039_v13 = vadd.f32 1.0, %v2976_v54 }
 0x91b   : > { %v2980_v3 = vpop.eup %2979  ;;  %v2038_v60 = vadd.f32 1.0, %v2978_v56 }
 0x91c   : > { %v2040_v15 = vadd.f32 1.0, %v2980_v3  ;;  %v2047_v26 = vmul.f32 %v2039_v13, %v1983_v61 }
 0x91d   : > { %v2982_v57 = vpop.eup %2981  ;;  %v2046_v28 = vmul.f32 %v2038_v60, %v1982_v23 }
 0x91e   : > { %v2041_v0 = vadd.f32 1.0, %v2982_v57  ;;  %v2048_v25 = vmul.f32 %v2040_v15, %v1984_v58 }
 0x920   : > { %v2049_v27 = vmul.f32 %v2041_v0, %v1985_v62  ;;  %v2054_v29 = vpack.c.bf16 %v2048_v25, %v2046_v28 }
 0x922   : > { %v2055_v4 = vpack.c.bf16 %v2049_v27, %v2047_v26 }
 0x924   : > { %2190 = vmatprep.mubr.bf16.mxu0 %v2055_v4 }
 0x925   : > { %2191 = vmatmul.mubr.bf16.vlgmr.msra.gmra.mxu0 %v2054_v29 }
 0x96d   : > { %v1776_v31 = vpop.xlane.xlu0 %1775 }
 0x96e   : > { %v1781_v32 = vmul.f32 0.0078125, %v1776_v31 }
 0x970   : > { %v1805_v36 = vmul.f32 %v1781_v32, %v1781_v32  ;;  %v1801_v42 = vsub.f32 %v3900_v30, %v1781_v32 }
 0x971   : > { %v1792_v33 = vpop.xlane.xlu0 %1791  ;;  %v1778_v34 = vpop.xlane.xlu1 %1777 }
 0x972   : > { %v1797_v5 = vmul.f32 0.0078125, %v1792_v33  ;;  %v1782_v37 = vmul.f32 0.0078125, %v1778_v34 }
 0x974   : > { %v1809_v38 = vsub.f32 %v1797_v5, %v1805_v36  ;;  %v1806_v9 = vmul.f32 %v1782_v37, %v1782_v37  ;;  %v1802_v6 = vsub.f32 %v3904_v35, %v1782_v37 }
 0x975   : > { %v1794_v10 = vpop.xlane.xlu1 %1793 }
 0x976   : > { %v1813_v24 = vadd.f32 1e-05, %v1809_v38  ;;  %v1798_v19 = vmul.f32 0.0078125, %v1794_v10 }
 0x978   : > { %2983 = vrsqrt.f32 %v1813_v24  ;;  %v1810_v39 = vsub.f32 %v1798_v19, %v1806_v9 }
 0x97a   : > { %v1814_v40 = vadd.f32 1e-05, %v1810_v39 }
 0x97c   : > { %2985 = vrsqrt.f32 %v1814_v40 }
 0x985   : > { %v2984_v45 = vpop.eup %2983 }
 0x986   : > { %v1821_v46 = vmul.f32 %v2984_v45, %v1801_v42 }
 0x988   : > { %v1829_v59 = vmul.f32 %v3869_v16, %v1821_v46 }
 0x989   : > { %v2986_v44 = vpop.eup %2985 }
 0x98a   : > { %v1822_v47 = vmul.f32 %v2986_v44, %v1802_v6  ;;  %v1837_v1 = vadd.f32 %v3877_v11, %v1829_v59 }
 0x98c   : > { %v1830_v63 = vmul.f32 %v3869_v16, %v1822_v47 }
 0x98e   : > { %v1838_v2 = vadd.f32 %v3877_v11, %v1830_v63 }
 0x990   : > { %v1840_v48 = vpack.c.bf16 %v1838_v2, %v1837_v1 }
 0x992   : > { %1972 = vmatmul.mubr.bf16.gmra.mxu1 %v1840_v48 }
 0x9e5   : > { %v2572_v49 = vpop.f32.mrf.mxu0 }
 0x9e7   : > { %v2573_v51 = vpop.f32.mrf.mxu0 }
 0x9e8   : > { %v2574_v17 = vadd.f32 %v2573_v51, %v2572_v49 }
 0x9e9   : > { %v2575_v21 = vpop.f32.mrf.mxu0 }
 0x9ea   : > { %v2193_v52 = vadd.f32 %v2574_v17, %v3933_v50 }
 0x9eb   : > { %v2576_v55 = vpop.f32.mrf.mxu0 }
 0x9ec   : > { %v2207_v16 = vadd.f32 %v2193_v52, %v3817_v43  ;;  %v2577_v53 = vadd.f32 %v2576_v55, %v2575_v21 }
 0x9ee   : > { %2211 = vst [vmem:[#allocation13] sm:$0xff] %v2207_v16  ;;  %v2196_v11 = vadd.f32 %v2577_v53, %v3933_v50 }
 0x9f0   : > { %v2208_v22 = vadd.f32 %v2196_v11, %v3828_v14 }
 0x9f2   : > { %2212 = vst [vmem:[#allocation13 + $0x8] sm:$0xff] %v2208_v22 }
 0xa52   : > { %v1973_v12 = vpop.f32.mrf.mxu1 }
 0xa53   : > { %v1974_v41 = vadd.f32 %v1973_v12, %v3917_v7 }
 0xa54   : > { %v1975_v8 = vpop.f32.mrf.mxu1 }
 0xa55   : > { %v1994_v54 = vmul.f32 0.044715, %v1974_v41  ;;  %v1976_v56 = vadd.f32 %v1975_v8, %v3919_v18  ;;  %v1986_v42 = vmul.f32 0.5, %v1974_v41 }
 0xa56   : > { %v1977_v3 = vpop.f32.mrf.mxu1 }
 0xa57   : > { %v2002_v13 = vmul.f32 %v1994_v54, %v1974_v41  ;;  %v1995_v15 = vmul.f32 0.044715, %v1976_v56  ;;  %v1978_v57 = vadd.f32 %v1977_v3, %v3917_v7  ;;  %v1987_v19 = vmul.f32 0.5, %v1976_v56 }
 0xa58   : > { %v1979_v43 = vpop.f32.mrf.mxu1 }
 0xa59   : > { %v2010_v58 = vmul.f32 %v2002_v13, %v1974_v41  ;;  %v2003_v60 = vmul.f32 %v1995_v15, %v1976_v56  ;;  %v1996_v61 = vmul.f32 0.044715, %v1978_v57  ;;  %v1980_v62 = vadd.f32 %v1979_v43, %v3919_v18 }
 0xa5a   : > { %v1988_v24 = vmul.f32 0.5, %v1978_v57 }
 0xa5b   : > { %v2011_v14 = vmul.f32 %v2003_v60, %v1976_v56  ;;  %v2004_v0 = vmul.f32 %v1996_v61, %v1978_v57  ;;  %v1997_v23 = vmul.f32 0.044715, %v1980_v62  ;;  %v2018_v25 = vadd.f32 %v2010_v58, %v1974_v41 }
 0xa5c   : > { %v1989_v39 = vmul.f32 0.5, %v1980_v62 }
 0xa5d   : > { %v2012_v26 = vmul.f32 %v2004_v0, %v1978_v57  ;;  %v2005_v27 = vmul.f32 %v1997_v23, %v1980_v62  ;;  %v2019_v28 = vadd.f32 %v2011_v14, %v1976_v56  ;;  %v2026_v4 = vmul.f32 0.7978846, %v2018_v25 }
 0xa5f   : > { %v2013_v29 = vmul.f32 %v2005_v27, %v1980_v62  ;;  %v2027_v31 = vmul.f32 0.7978846, %v2019_v28  ;;  %v2020_v32 = vadd.f32 %v2012_v26, %v1978_v57 }
 0xa61   : > { %v2021_v33 = vadd.f32 %v2013_v29, %v1980_v62  ;;  %2987 = vtanh.f32 %v2027_v31  ;;  %v2028_v7 = vmul.f32 0.7978846, %v2020_v32 }
 0xa62   : > { %2989 = vtanh.f32 %v2026_v4 }
 0xa63   : > { %v2029_v34 = vmul.f32 0.7978846, %v2021_v33  ;;  %2991 = vtanh.f32 %v2028_v7 }
 0xa65   : > { %2993 = vtanh.f32 %v2029_v34 }
 0xa6e   : > { %v2988_v36 = vpop.eup %2987 }
 0xa6f   : > { %v2990_v18 = vpop.eup %2989  ;;  %v2043_v37 = vadd.f32 1.0, %v2988_v36 }
 0xa70   : > { %v2992_v5 = vpop.eup %2991  ;;  %v2042_v9 = vadd.f32 1.0, %v2990_v18 }
 0xa71   : > { %v2044_v38 = vadd.f32 1.0, %v2992_v5  ;;  %v2051_v46 = vmul.f32 %v2043_v37, %v1987_v19 }
 0xa72   : > { %v2994_v10 = vpop.eup %2993  ;;  %v2050_v44 = vmul.f32 %v2042_v9, %v1986_v42 }
 0xa73   : > { %v2045_v40 = vadd.f32 1.0, %v2994_v10  ;;  %v2052_v45 = vmul.f32 %v2044_v38, %v1988_v24 }
 0xa75   : > { %v2053_v6 = vmul.f32 %v2045_v40, %v1989_v39  ;;  %v2056_v59 = vpack.c.bf16 %v2052_v45, %v2050_v44 }
 0xa77   : > { %v2057_v47 = vpack.c.bf16 %v2053_v6, %v2051_v46 }
 0xa79   : > { %2198 = vmatprep.mubr.bf16.mxu0 %v2057_v47 }
 0xa7a   : > { %2199 = vmatmul.mubr.bf16.gmra.mxu0 %v2056_v59 }
 0xb3a   : > { %v2578_v63 = vpop.f32.mrf.mxu0 }
 0xb3c   : > { %v2579_v1 = vpop.f32.mrf.mxu0 }
 0xb3d   : > { %v2580_v2 = vadd.f32 %v2579_v1, %v2578_v63 }
 0xb3e   : > { %v2581_v48 = vpop.f32.mrf.mxu0 }
 0xb3f   : > { %v2201_v20 = vadd.f32 %v2580_v2, %v3933_v50 }
 0xb40   : > { %v2582_v49 = vpop.f32.mrf.mxu0 }
 0xb41   : > { %v2209_v51 = vadd.f32 %v2201_v20, %v3900_v30  ;;  %v2583_v17 = vadd.f32 %v2582_v49, %v2581_v48 }
 0xb43   : > { %2213 = vst [vmem:[#allocation13 + $0x10] sm:$0xff] %v2209_v51  ;;  %v2204_v21 = vadd.f32 %v2583_v17, %v3933_v50 }
 0xb45   : > { %v2210_v52 = vadd.f32 %v2204_v21, %v3904_v35 }
 0xb47   : > { %2214 = vst [vmem:[#allocation13 + $0x18] sm:$0xff] %v2210_v52 }
 0xb48   : > { %3179 = shalt.err (!%p3176_p3)
}
 0xb49   : > { %s3258_s19 = smov 128   ;;  %s3259_s30 = smov 8  }
 0xb4a   : > { %2730 = dma.vmem_to_hbm [thread:$0]  (%p2756_p0), %s2222_s24, 512, %s3978_s6, [#allocation4], %s3258_s19, %s3258_s19, %s3259_s30  }
 0xb4b   : > { %3223 = dma.done.wait (%p2756_p0), [#allocation4], 512  }
 0xb4c   : > { %3225 = vsyncadd (%p2756_p0), [#allocation4], 4294966784 }
 0xb4d PF: > { %s4003_s8 = sld [smem:[#allocation19_spill]]  ;;  %p24_p1 = scmp.ge.s32.totalorder %s3316_s25, 4  }
 0xb4e   : > { %s4004_s23 = sld [smem:[#allocation20_spill]]  ;;  %s4005_s21 = smov %s3232_s22 }
 0xb4f   : > { %s4007_s24 = smov %s3316_s25  ;;  %26 = sbr.rel (!%p24_p1) target bundleno = 12 (0xc), region = 138 }
 0xb53   : > { %s4006_s22 = smov %s4003_s8 }
 0xb54   :  { %2237 = vsyncpa [#allocation3], 1 }
 0xb55   :  { %2239 = vsyncpa [#allocation3 + $0x1], 1 }
 0xb56   :  { %2240 = vsyncpa [#allocation6], 1 }
 0xb57   :  { %2242 = vsyncpa [#allocation6 + $0x1], 1 }
 0xb58   :  { %2243 = vsyncpa [#allocation9], 1 }
 0xb59   :  { %2245 = vsyncpa [#allocation9 + $0x1], 1 }
 0xb5a   :  { %2246 = vsyncpa [#allocation12], 1 }
 0xb5b   :  { %2248 = vsyncpa [#allocation12 + $0x1], 1 }
 0xb5c   :  { %2249 = vsyncpa [#allocation4], 1 }
 0xb5d   :  { %2251 = vsyncpa [#allocation4 + $0x1], 1 }

</bundles_post_ra>
